<compile_context>
chip_gen: v7x
topology: tpu7x:2x2x1
jax: 0.10.0
libtpu: 0.0.40
codegen_flags: <defaults>
</compile_context>

<pallas_src>
import numpy as np
import jax
import jax.numpy as jnp
from jax.experimental import pallas as pl
from jax.experimental.pallas import tpu as pltpu


# ----------------------------------------------------------------------------
# small helpers
# ----------------------------------------------------------------------------
def _round_up(x, m):
    return ((x + m - 1) // m) * m


def _relu_linear(x, w, b):
    """relu(x @ w + b) in f32 (MXU matmul + VPU epilogue, all in-register)."""
    y = jnp.dot(x, w, preferred_element_type=jnp.float32) + b
    return jnp.maximum(y, 0.0)


# BSANet.points: fixed 2-D meshgrid over [-0.3, 0.3]^2, 46x46 (host constant)
_MESH = np.stack(np.meshgrid(np.linspace(-0.3, 0.3, 46),
                             np.linspace(-0.3, 0.3, 46))).astype(np.float32)


def sample_2D(m, n):
    ix = np.round(np.linspace(0, 45, m)).astype(int)
    iy = np.round(np.linspace(0, 45, n)).astype(int)
    x, y = np.meshgrid(ix, iy)
    p = _MESH[:, x.ravel(), y.ravel()].T          # (m*n, 2)
    return jnp.asarray(p, dtype=jnp.float32)


# ----------------------------------------------------------------------------
# Fully fused FoldingBlock kernel:
#   p1 = Up(p); p_delta = p - M_down(reshape(p1)); p2 = Up(p_delta); out = p1+p2
# ----------------------------------------------------------------------------
def _make_fused_kernel(*, ratio, in_pts, dh_pad, F_out, F_pad,
                       n_up_extra, n_f, n_down, attn_dtype):
    def kernel(*refs):
        it = iter(refs)
        p_ref = next(it)                       # (1, IN, C)
        w_up_p_ref = next(it)                  # (C, C_UP0)
        pts_term_ref = next(it)                # (OUT, C_UP0) == pts @ W_pts + b_up0
        up_extra = [(next(it), next(it)) for _ in range(n_up_extra)]
        w_lhg_p_ref = next(it)                 # (C, LHG)
        w_lhg_x_ref = next(it)                 # (C_UP, LHG)
        b_lhg_ref = next(it)                   # (1, LHG)
        f_layers = [(next(it), next(it)) for _ in range(n_f)]
        down_layers = [(next(it), next(it)) for _ in range(n_down)]
        out_ref = next(it)                     # (1, OUT, F_out)

        # Hoist all weight loads out of the twice-traced Up body.
        w_up_p = w_up_p_ref[...]
        pts_term = pts_term_ref[...]
        up_extra_v = [(w[...], b[...]) for (w, b) in up_extra]
        w_lhg_p = w_lhg_p_ref[...]
        w_lhg_x = w_lhg_x_ref[...]
        b_lhg = b_lhg_ref[...]
        f_layers_v = [(w[...], b[...]) for (w, b) in f_layers]
        down_layers_v = [(w[...], b[...]) for (w, b) in down_layers]

        def up(p_b):
            # M_up layer 0: relu(tile(p_b,r) @ W_p + pts@W_pts + b)
            #             == relu(tile(p_b @ W_p, r) + pts_term)
            x = jnp.maximum(
                jnp.tile(jnp.dot(p_b, w_up_p,
                                 preferred_element_type=jnp.float32),
                         (ratio, 1)) + pts_term, 0.0)             # (OUT, C_UP0)
            for (w, b) in up_extra_v:
                x = _relu_linear(x, w, b)                         # (OUT, C_UP)

            # Fused l|h|g matmul, rows split so p_cat is never an MXU operand;
            # l/h are zero-padded to 128-aligned widths -> lane-aligned slices.
            lhg = jnp.maximum(
                jnp.tile(jnp.dot(p_b, w_lhg_p,
                                 preferred_element_type=jnp.float32),
                         (ratio, 1))
                + jnp.dot(x, w_lhg_x, preferred_element_type=jnp.float32)
                + b_lhg, 0.0)                                     # (OUT, LHG)
            l = lhg[:, :dh_pad]
            h = lhg[:, dh_pad:2 * dh_pad]
            g = lhg[:, 2 * dh_pad:]                               # (OUT, D), unpadded

            # Attention: the two OUT^2 matmuls in bf16, f32 accumulate/softmax.
            mm = jax.lax.dot_general(
                l.astype(attn_dtype), h.astype(attn_dtype),
                (((1,), (1,)), ((), ())),
                preferred_element_type=jnp.float32)               # l @ h^T  (OUT, OUT)
            mm = mm - jnp.max(mm, axis=-1, keepdims=True)
            e = jnp.exp(mm)
            inv = pl.reciprocal(jnp.sum(e, axis=-1, keepdims=True), approx=False)
            attn = e * inv                                        # softmax(dim=-1)
            applied = jnp.dot(attn.astype(attn_dtype), g.astype(attn_dtype),
                              preferred_element_type=jnp.float32)  # (OUT, D)

            # Skip connection + M_f (ReLU after every Linear, incl. the last).
            y = jnp.concatenate([jnp.tile(p_b, (ratio, 1)), x], axis=-1) + applied
            for (w, b) in f_layers_v:
                y = _relu_linear(y, w, b)
            return y                           # (OUT, F_pad); padded cols exactly 0

        p_b = p_ref[0]                         # (IN, C)
        p1 = up(p_b)                           # stays in VMEM — no HBM round trip

        # Down + delta: lane-aligned reshape of the padded p1; matching zero
        # rows were inserted in M_down's first-layer weight.
        d = p1.reshape(in_pts, ratio * F_pad)
        for (w, b) in down_layers_v:
            d = _relu_linear(d, w, b)          # (IN, C)

        p2 = up(p_b - d)
        out_ref[0] = (p1 + p2)[:, :F_out].astype(out_ref.dtype)

    return kernel


# ----------------------------------------------------------------------------
# One-time preparation: hoist the pts term, split/pack weights, lane-align.
# ----------------------------------------------------------------------------
def prepare_folding_block(params, m, n, in_shape, out_shape, *,
                          attn_matmul_dtype=jnp.bfloat16):
    assert out_shape % in_shape == 0 and m * n == out_shape
    ratio = out_shape // in_shape
    attn = params["attn"]

    # M_up: split layer-0 rows into the p part and the constant 2-D grid part;
    # precompute pts @ W_pts + b once (batch invariant).
    up_layers = params["M_up"]
    w_up0, b_up0 = up_layers[0]
    C = w_up0.shape[0] - 2
    pts = sample_2D(m, n)                                          # (OUT, 2)
    w_up_p = w_up0[:C, :]
    pts_term = (pts @ w_up0[C:, :] + b_up0).astype(jnp.float32)    # (OUT, C_UP0)
    up_extra = [(w, b.reshape(1, -1)) for (w, b) in up_layers[1:]]
    c_up = up_layers[-1][0].shape[1]
    D = C + c_up

    # Self-attention l/h/g: single-layer MLPs in BSANet -> one fused wide
    # matmul.  l/h zero-padded to a 128 multiple (exact for l@h^T); g unpadded.
    for k in ("M_l", "M_h", "M_g"):
        assert len(attn[k]) == 1, "fused path expects single-layer M_l/M_h/M_g"
    (w_h, b_h), = attn["M_h"]
    (w_l, b_l), = attn["M_l"]
    (w_g, b_g), = attn["M_g"]
    assert w_l.shape[0] == D and w_g.shape[1] == D
    assert w_l.shape[1] == w_h.shape[1], "l/h feature dims must match"
    dh = w_l.shape[1]
    dh_pad = _round_up(dh, 128)

    def pad_cols(w, b, width):
        extra = width - w.shape[1]
        return jnp.pad(w, ((0, 0), (0, extra))), jnp.pad(b, ((0, extra),))

    w_l_p, b_l_p = pad_cols(w_l, b_l, dh_pad)
    w_h_p, b_h_p = pad_cols(w_h, b_h, dh_pad)
    w_lhg = jnp.concatenate([w_l_p, w_h_p, w_g], axis=1)           # (D, 2*dh_pad+D)
    b_lhg = jnp.concatenate([b_l_p, b_h_p, b_g]).reshape(1, -1)
    w_lhg_p, w_lhg_x = w_lhg[:C, :], w_lhg[C:, :]

    # M_f: last layer lane-padded to F_pad with zero cols (ReLU keeps them 0).
    f_src = attn["M_f"]
    assert f_src[0][0].shape[0] == D
    F_out = f_src[-1][0].shape[1]
    F_pad = _round_up(F_out, 128)
    f_layers = []
    for i, (w, b) in enumerate(f_src):
        if i == len(f_src) - 1 and F_pad != F_out:
            w, b = pad_cols(w, b, F_pad)
        f_layers.append((w, b.reshape(1, -1)))

    # M_down: insert zero rows in the first-layer weight so the kernel can
    # reshape the lane-padded (OUT, F_pad) p1 directly (exact).
    d_src = params["M_down"]
    assert d_src[0][0].shape[0] == ratio * F_out
    assert d_src[-1][0].shape[1] == C
    down_layers = []
    for i, (w, b) in enumerate(d_src):
        if i == 0 and F_pad != F_out:
            w = jnp.pad(w.reshape(ratio, F_out, -1),
                        ((0, 0), (0, F_pad - F_out), (0, 0))
                        ).reshape(ratio * F_pad, -1)
        down_layers.append((w, b.reshape(1, -1)))

    return {
        "in_shape": in_shape, "out_shape": out_shape, "ratio": ratio,
        "C": C, "D": D, "dh_pad": dh_pad, "F_out": F_out, "F_pad": F_pad,
        "w_up_p": w_up_p, "pts_term": pts_term, "up_extra": up_extra,
        "w_lhg_p": w_lhg_p, "w_lhg_x": w_lhg_x, "b_lhg": b_lhg,
        "f_layers": f_layers, "down_layers": down_layers,
        "attn_matmul_dtype": attn_matmul_dtype,
    }


def _flat(pairs):
    return [t for pair in pairs for t in pair]


def folding_block_forward(plan, p):
    """FoldingBlock.forward: p1 = Up(p); p2 = Up(p - Down(p1)); return p1+p2."""
    B, IN, C = p.shape
    assert IN == plan["in_shape"] and C == plan["C"]
    OUT, F_out, F_pad = plan["out_shape"], plan["F_out"], plan["F_pad"]

    consts = ([plan["w_up_p"], plan["pts_term"]] + _flat(plan["up_extra"])
              + [plan["w_lhg_p"], plan["w_lhg_x"], plan["b_lhg"]]
              + _flat(plan["f_layers"]) + _flat(plan["down_layers"]))
    inputs = [p] + consts
    in_specs = ([pl.BlockSpec((1, IN, C), lambda b: (b, 0, 0))]
                + [pl.BlockSpec(a.shape, lambda b: (0, 0)) for a in consts])

    kernel = _make_fused_kernel(
        ratio=plan["ratio"], in_pts=IN, dh_pad=plan["dh_pad"],
        F_out=F_out, F_pad=F_pad,
        n_up_extra=len(plan["up_extra"]), n_f=len(plan["f_layers"]),
        n_down=len(plan["down_layers"]), attn_dtype=plan["attn_matmul_dtype"])

    # Explicit VMEM budget: operands (double-buffer headroom) + attention /
    # MLP working set, clamped to sane per-generation bounds.
    LHG = plan["b_lhg"].shape[1]
    const_bytes = sum(int(np.prod(a.shape)) * a.dtype.itemsize for a in inputs)
    out_bytes = B * OUT * F_out * p.dtype.itemsize
    work = 4 * (4 * OUT * OUT
                + OUT * (2 * LHG + 3 * F_pad + 2 * plan["D"] + 2 * C))
    vmem_limit = int(min(127 * 2**20,
                         max(32 * 2**20, 2 * (2 * const_bytes + out_bytes + work))))

    return pl.pallas_call(
        kernel,
        out_shape=jax.ShapeDtypeStruct((B, OUT, F_out), p.dtype),
        grid=(B,),
        in_specs=in_specs,
        out_specs=pl.BlockSpec((1, OUT, F_out), lambda b: (b, 0, 0)),
        compiler_params=pltpu.CompilerParams(
            dimension_semantics=("parallel",),
            vmem_limit_bytes=vmem_limit),
    )(*inputs)


# ----------------------------------------------------------------------------
# Deterministic parameter init (PyTorch nn.Linear-style uniform)
# ----------------------------------------------------------------------------
def init_linear(key, fan_in, fan_out):
    kw, kb = jax.random.split(key)
    lim = 1.0 / np.sqrt(fan_in)
    w = jax.random.uniform(kw, (fan_in, fan_out), jnp.float32, -lim, lim)
    b = jax.random.uniform(kb, (fan_out,), jnp.float32, -lim, lim)
    return (w, b)


def init_mlp(key, channels):
    layers = []
    for i in range(1, len(channels)):
        key, sub = jax.random.split(key)
        layers.append(init_linear(sub, channels[i - 1], channels[i]))
    return layers


def init_folding_block(key, attn_channels, up_channels, down_channels):
    keys = jax.random.split(key, 6)
    # NOTE: the torch module also builds self_attn2 / M_up2 / M_down2, but they
    # are never used in forward(), so they are not instantiated here.
    return {
        "attn": {
            "M_h": init_mlp(keys[0], attn_channels[0]),
            "M_l": init_mlp(keys[1], attn_channels[1]),
            "M_g": init_mlp(keys[2], attn_channels[2]),
            "M_f": init_mlp(keys[3], attn_channels[3]),
        },
        "M_up": init_mlp(keys[4], up_channels),
        "M_down": init_mlp(keys[5], down_channels),
    }


# ----------------------------------------------------------------------------
# Pure-JAX reference (mirrors the torch module) for numerical sanity checks.
# ----------------------------------------------------------------------------
def _ref_mlp(layers, x):
    for (w, b) in layers:
        x = jax.nn.relu(x @ w + b)
    return x


def _ref_forward(params, p, m, n, in_shape, out_shape):
    ratio = out_shape // in_shape
    attn = params["attn"]
    pts = sample_2D(m, n)

    def up(pp):
        B = pp.shape[0]
        p_rep = jnp.tile(pp, (1, ratio, 1))
        p2d = jnp.concatenate(
            [p_rep, jnp.broadcast_to(pts[None], (B,) + pts.shape)], axis=-1)
        p2d = _ref_mlp(params["M_up"], p2d)
        pc = jnp.concatenate([p_rep, p2d], axis=-1)
        h = _ref_mlp(attn["M_h"], pc)
        l = _ref_mlp(attn["M_l"], pc)
        g = _ref_mlp(attn["M_g"], pc)
        mm = jnp.einsum("bik,bjk->bij", l, h)
        w = jax.nn.softmax(mm, axis=-1)
        return _ref_mlp(attn["M_f"], pc + jnp.einsum("bij,bjd->bid", w, g))

    def down(p1):
        x = p1.reshape(-1, in_shape, ratio * p1.shape[2])
        return _ref_mlp(params["M_down"], x)

    p1 = up(p)
    p_delta = p - down(p1)
    return p1 + up(p_delta)


# ----------------------------------------------------------------------------
if __name__ == "__main__":
    # Small, self-consistent FoldingBlock config (scaled-down analogue of
    # folding1 in BSANet: in_shape -> out_shape doubling, feature dim C):
    B, IN_SHAPE, OUT_SHAPE, C = 2, 8, 16, 32
    m, n = 4, 4                       # m*n == OUT_SHAPE (points for sample_2D)
    C_UP = 32                         # NN_up output width
    D = C + C_UP                      # feature dim entering self-attention
    F_OUT = 32                        # self-attn M_f output width
    RATIO = OUT_SHAPE // IN_SHAPE

    key = jax.random.PRNGKey(0)
    kp, kparams = jax.random.split(key)
    p = jax.random.normal(kp, (B, IN_SHAPE, C), jnp.float32)

    params = init_folding_block(
        kparams,
        attn_channels=([D, 16], [D, 16], [D, D], [D, 32, F_OUT]),
        up_channels=[C + 2, C_UP],
        down_channels=[RATIO * F_OUT, C],
    )

    ref = _ref_forward(params, p, m, n, IN_SHAPE, OUT_SHAPE)

    # 1) f32 attention matmuls: validates the fused-kernel structure tightly.
    plan_f32 = prepare_folding_block(params, m, n, IN_SHAPE, OUT_SHAPE,
                                     attn_matmul_dtype=jnp.float32)
    out_f32 = jax.block_until_ready(
        jax.jit(lambda x: folding_block_forward(plan_f32, x))(p))
    assert out_f32.shape == (B, OUT_SHAPE, F_OUT), out_f32.shape
    assert bool(jnp.all(jnp.isfinite(out_f32)))
    assert bool(jnp.allclose(out_f32, ref, atol=2e-2, rtol=2e-2))

    # 2) bf16 OUT^2 attention matmuls (the performance configuration).
    plan_bf16 = prepare_folding_block(params, m, n, IN_SHAPE, OUT_SHAPE,
                                      attn_matmul_dtype=jnp.bfloat16)
    out_bf16 = jax.block_until_ready(
        jax.jit(lambda x: folding_block_forward(plan_bf16, x))(p))
    assert out_bf16.shape == (B, OUT_SHAPE, F_OUT), out_bf16.shape
    assert bool(jnp.all(jnp.isfinite(out_bf16)))
    assert bool(jnp.allclose(out_bf16, out_f32, atol=1e-1, rtol=1e-1))

    print("KERNEL_OK")
</pallas_src>

<mosaic_0001>
module attributes {stable_mosaic.version = 11 : i64} {
  func.func @kernel(%arg0: i32, %arg1: memref<1x8x32xf32, #tpu.memory_space<vmem>>, %arg2: memref<32x32xf32, #tpu.memory_space<vmem>>, %arg3: memref<16x32xf32, #tpu.memory_space<vmem>>, %arg4: memref<32x320xf32, #tpu.memory_space<vmem>>, %arg5: memref<32x320xf32, #tpu.memory_space<vmem>>, %arg6: memref<1x320xf32, #tpu.memory_space<vmem>>, %arg7: memref<64x32xf32, #tpu.memory_space<vmem>>, %arg8: memref<1x32xf32, #tpu.memory_space<vmem>>, %arg9: memref<32x128xf32, #tpu.memory_space<vmem>>, %arg10: memref<1x128xf32, #tpu.memory_space<vmem>>, %arg11: memref<256x32xf32, #tpu.memory_space<vmem>>, %arg12: memref<1x32xf32, #tpu.memory_space<vmem>>, %arg13: memref<1x16x32xf32, #tpu.memory_space<vmem>>) attributes {dimension_semantics = [#tpu.dimension_semantics<parallel>], iteration_bounds = array<i64: 2>, scalar_prefetch = 0 : i64, scratch_operands = 0 : i64, tpu.core_type = #tpu.core_type<tc>, window_params = [{transform_indices = @transform_0, window_bounds = array<i64: 1, 8, 32>}, {pipeline_mode = #tpu.pipeline_mode<synchronous>, transform_indices = @transform_1, window_bounds = array<i64: 32, 32>}, {pipeline_mode = #tpu.pipeline_mode<synchronous>, transform_indices = @transform_2, window_bounds = array<i64: 16, 32>}, {pipeline_mode = #tpu.pipeline_mode<synchronous>, transform_indices = @transform_3, window_bounds = array<i64: 32, 320>}, {pipeline_mode = #tpu.pipeline_mode<synchronous>, transform_indices = @transform_4, window_bounds = array<i64: 32, 320>}, {pipeline_mode = #tpu.pipeline_mode<synchronous>, transform_indices = @transform_5, window_bounds = array<i64: 1, 320>}, {pipeline_mode = #tpu.pipeline_mode<synchronous>, transform_indices = @transform_6, window_bounds = array<i64: 64, 32>}, {pipeline_mode = #tpu.pipeline_mode<synchronous>, transform_indices = @transform_7, window_bounds = array<i64: 1, 32>}, {pipeline_mode = #tpu.pipeline_mode<synchronous>, transform_indices = @transform_8, window_bounds = array<i64: 32, 128>}, {pipeline_mode = #tpu.pipeline_mode<synchronous>, transform_indices = @transform_9, window_bounds = array<i64: 1, 128>}, {pipeline_mode = #tpu.pipeline_mode<synchronous>, transform_indices = @transform_10, window_bounds = array<i64: 256, 32>}, {pipeline_mode = #tpu.pipeline_mode<synchronous>, transform_indices = @transform_11, window_bounds = array<i64: 1, 32>}, {transform_indices = @transform_12, window_bounds = array<i64: 1, 16, 32>}]} {
    %c0 = arith.constant 0 : index
    %c0_0 = arith.constant 0 : index
    %0 = vector.load %arg2[%c0, %c0_0] : memref<32x32xf32, #tpu.memory_space<vmem>>, vector<32x32xf32>
    %c0_1 = arith.constant 0 : index
    %c0_2 = arith.constant 0 : index
    %1 = vector.load %arg3[%c0_1, %c0_2] : memref<16x32xf32, #tpu.memory_space<vmem>>, vector<16x32xf32>
    %c0_3 = arith.constant 0 : index
    %c0_4 = arith.constant 0 : index
    %2 = vector.load %arg4[%c0_3, %c0_4] : memref<32x320xf32, #tpu.memory_space<vmem>>, vector<32x320xf32>
    %c0_5 = arith.constant 0 : index
    %c0_6 = arith.constant 0 : index
    %3 = vector.load %arg5[%c0_5, %c0_6] : memref<32x320xf32, #tpu.memory_space<vmem>>, vector<32x320xf32>
    %c0_7 = arith.constant 0 : index
    %c0_8 = arith.constant 0 : index
    %4 = vector.load %arg6[%c0_7, %c0_8] : memref<1x320xf32, #tpu.memory_space<vmem>>, vector<1x320xf32>
    %c0_9 = arith.constant 0 : index
    %c0_10 = arith.constant 0 : index
    %5 = vector.load %arg7[%c0_9, %c0_10] : memref<64x32xf32, #tpu.memory_space<vmem>>, vector<64x32xf32>
    %c0_11 = arith.constant 0 : index
    %c0_12 = arith.constant 0 : index
    %6 = vector.load %arg8[%c0_11, %c0_12] : memref<1x32xf32, #tpu.memory_space<vmem>>, vector<1x32xf32>
    %c0_13 = arith.constant 0 : index
    %c0_14 = arith.constant 0 : index
    %7 = vector.load %arg9[%c0_13, %c0_14] : memref<32x128xf32, #tpu.memory_space<vmem>>, vector<32x128xf32>
    %c0_15 = arith.constant 0 : index
    %c0_16 = arith.constant 0 : index
    %8 = vector.load %arg10[%c0_15, %c0_16] : memref<1x128xf32, #tpu.memory_space<vmem>>, vector<1x128xf32>
    %c0_17 = arith.constant 0 : index
    %c0_18 = arith.constant 0 : index
    %9 = vector.load %arg11[%c0_17, %c0_18] : memref<256x32xf32, #tpu.memory_space<vmem>>, vector<256x32xf32>
    %c0_19 = arith.constant 0 : index
    %c0_20 = arith.constant 0 : index
    %10 = vector.load %arg12[%c0_19, %c0_20] : memref<1x32xf32, #tpu.memory_space<vmem>>, vector<1x32xf32>
    %c0_21 = arith.constant 0 : index
    %c0_22 = arith.constant 0 : index
    %c0_23 = arith.constant 0 : index
    %11 = vector.load %arg1[%c0_21, %c0_22, %c0_23] : memref<1x8x32xf32, #tpu.memory_space<vmem>>, vector<1x8x32xf32>
    %12 = vector.shape_cast %11 : vector<1x8x32xf32> to vector<8x32xf32>
    %cst = arith.constant dense<0.000000e+00> : vector<8x32xf32>
    %13 = tpu.matmul %12, %0, %cst {dimension_numbers = #tpu.dot_dimension_numbers<[1], [0], [0], [1], [0, 0, 1, 1], [], []>} : vector<8x32xf32>, vector<32x32xf32>, vector<8x32xf32> -> vector<8x32xf32>
    %14 = tpu.concatenate %13, %13 in 0 : vector<8x32xf32>, vector<8x32xf32> -> vector<16x32xf32>
    %15 = arith.addf %14, %1 : vector<16x32xf32>
    %cst_24 = arith.constant 0.000000e+00 : f32
    %16 = vector.broadcast %cst_24 : f32 to vector<16x32xf32>
    %17 = arith.maximumf %15, %16 : vector<16x32xf32>
    %cst_25 = arith.constant dense<0.000000e+00> : vector<8x320xf32>
    %18 = tpu.matmul %12, %2, %cst_25 {dimension_numbers = #tpu.dot_dimension_numbers<[1], [0], [0], [1], [0, 0, 1, 1], [], []>} : vector<8x32xf32>, vector<32x320xf32>, vector<8x320xf32> -> vector<8x320xf32>
    %19 = tpu.concatenate %18, %18 in 0 : vector<8x320xf32>, vector<8x320xf32> -> vector<16x320xf32>
    %cst_26 = arith.constant dense<0.000000e+00> : vector<16x320xf32>
    %20 = tpu.matmul %17, %3, %cst_26 {dimension_numbers = #tpu.dot_dimension_numbers<[1], [0], [0], [1], [0, 0, 1, 1], [], []>} : vector<16x32xf32>, vector<32x320xf32>, vector<16x320xf32> -> vector<16x320xf32>
    %21 = arith.addf %19, %20 : vector<16x320xf32>
    %22 = vector.broadcast %4 : vector<1x320xf32> to vector<16x320xf32>
    %23 = arith.addf %21, %22 : vector<16x320xf32>
    %cst_27 = arith.constant 0.000000e+00 : f32
    %24 = vector.broadcast %cst_27 : f32 to vector<16x320xf32>
    %25 = arith.maximumf %23, %24 : vector<16x320xf32>
    %26 = vector.extract_strided_slice %25 {offsets = [0, 0], sizes = [16, 128], strides = [1, 1]} : vector<16x320xf32> to vector<16x128xf32>
    %27 = vector.extract_strided_slice %25 {offsets = [0, 128], sizes = [16, 128], strides = [1, 1]} : vector<16x320xf32> to vector<16x128xf32>
    %28 = vector.extract_strided_slice %25 {offsets = [0, 256], sizes = [16, 64], strides = [1, 1]} : vector<16x320xf32> to vector<16x64xf32>
    %cst_28 = arith.constant dense<0.000000e+00> : vector<16x16xf32>
    %29 = tpu.matmul %26, %27, %cst_28 {dimension_numbers = #tpu.dot_dimension_numbers<[1], [1], [0], [0], [0, 0, 1, 0], [], []>} : vector<16x128xf32>, vector<16x128xf32>, vector<16x16xf32> -> vector<16x16xf32>
    %cst_29 = arith.constant dense<0xFF800000> : vector<16xf32>
    %30 = vector.multi_reduction <maximumf>, %29, %cst_29 [1] : vector<16x16xf32> to vector<16xf32>
    %31 = vector.shape_cast %30 : vector<16xf32> to vector<16x1xf32>
    %32 = vector.broadcast %31 : vector<16x1xf32> to vector<16x16xf32>
    %33 = arith.subf %29, %32 : vector<16x16xf32>
    %34 = math.exp %33 : vector<16x16xf32>
    %cst_30 = arith.constant dense<0.000000e+00> : vector<16xf32>
    %35 = vector.multi_reduction <add>, %34, %cst_30 [1] : vector<16x16xf32> to vector<16xf32>
    %36 = vector.shape_cast %35 : vector<16xf32> to vector<16x1xf32>
    %37 = tpu.reciprocal %36 : vector<16x1xf32> -> vector<16x1xf32>
    %38 = vector.broadcast %37 : vector<16x1xf32> to vector<16x16xf32>
    %39 = arith.mulf %34, %38 : vector<16x16xf32>
    %cst_31 = arith.constant dense<0.000000e+00> : vector<16x64xf32>
    %40 = tpu.matmul %39, %28, %cst_31 {dimension_numbers = #tpu.dot_dimension_numbers<[1], [0], [0], [1], [0, 0, 1, 1], [], []>} : vector<16x16xf32>, vector<16x64xf32>, vector<16x64xf32> -> vector<16x64xf32>
    %41 = tpu.concatenate %12, %12 in 0 : vector<8x32xf32>, vector<8x32xf32> -> vector<16x32xf32>
    %42 = tpu.concatenate %41, %17 in 1 : vector<16x32xf32>, vector<16x32xf32> -> vector<16x64xf32>
    %43 = arith.addf %42, %40 : vector<16x64xf32>
    %cst_32 = arith.constant dense<0.000000e+00> : vector<16x32xf32>
    %44 = tpu.matmul %43, %5, %cst_32 {dimension_numbers = #tpu.dot_dimension_numbers<[1], [0], [0], [1], [0, 0, 1, 1], [], []>} : vector<16x64xf32>, vector<64x32xf32>, vector<16x32xf32> -> vector<16x32xf32>
    %45 = vector.broadcast %6 : vector<1x32xf32> to vector<16x32xf32>
    %46 = arith.addf %44, %45 : vector<16x32xf32>
    %cst_33 = arith.constant 0.000000e+00 : f32
    %47 = vector.broadcast %cst_33 : f32 to vector<16x32xf32>
    %48 = arith.maximumf %46, %47 : vector<16x32xf32>
    %cst_34 = arith.constant dense<0.000000e+00> : vector<16x128xf32>
    %49 = tpu.matmul %48, %7, %cst_34 {dimension_numbers = #tpu.dot_dimension_numbers<[1], [0], [0], [1], [0, 0, 1, 1], [], []>} : vector<16x32xf32>, vector<32x128xf32>, vector<16x128xf32> -> vector<16x128xf32>
    %50 = vector.broadcast %8 : vector<1x128xf32> to vector<16x128xf32>
    %51 = arith.addf %49, %50 : vector<16x128xf32>
    %cst_35 = arith.constant 0.000000e+00 : f32
    %52 = vector.broadcast %cst_35 : f32 to vector<16x128xf32>
    %53 = arith.maximumf %51, %52 : vector<16x128xf32>
    %54 = vector.shape_cast %53 : vector<16x128xf32> to vector<8x256xf32>
    %cst_36 = arith.constant dense<0.000000e+00> : vector<8x32xf32>
    %55 = tpu.matmul %54, %9, %cst_36 {dimension_numbers = #tpu.dot_dimension_numbers<[1], [0], [0], [1], [0, 0, 1, 1], [], []>} : vector<8x256xf32>, vector<256x32xf32>, vector<8x32xf32> -> vector<8x32xf32>
    %56 = vector.broadcast %10 : vector<1x32xf32> to vector<8x32xf32>
    %57 = arith.addf %55, %56 : vector<8x32xf32>
    %cst_37 = arith.constant 0.000000e+00 : f32
    %58 = vector.broadcast %cst_37 : f32 to vector<8x32xf32>
    %59 = arith.maximumf %57, %58 : vector<8x32xf32>
    %60 = arith.subf %12, %59 : vector<8x32xf32>
    %cst_38 = arith.constant dense<0.000000e+00> : vector<8x32xf32>
    %61 = tpu.matmul %60, %0, %cst_38 {dimension_numbers = #tpu.dot_dimension_numbers<[1], [0], [0], [1], [0, 0, 1, 1], [], []>} : vector<8x32xf32>, vector<32x32xf32>, vector<8x32xf32> -> vector<8x32xf32>
    %62 = tpu.concatenate %61, %61 in 0 : vector<8x32xf32>, vector<8x32xf32> -> vector<16x32xf32>
    %63 = arith.addf %62, %1 : vector<16x32xf32>
    %cst_39 = arith.constant 0.000000e+00 : f32
    %64 = vector.broadcast %cst_39 : f32 to vector<16x32xf32>
    %65 = arith.maximumf %63, %64 : vector<16x32xf32>
    %cst_40 = arith.constant dense<0.000000e+00> : vector<8x320xf32>
    %66 = tpu.matmul %60, %2, %cst_40 {dimension_numbers = #tpu.dot_dimension_numbers<[1], [0], [0], [1], [0, 0, 1, 1], [], []>} : vector<8x32xf32>, vector<32x320xf32>, vector<8x320xf32> -> vector<8x320xf32>
    %67 = tpu.concatenate %66, %66 in 0 : vector<8x320xf32>, vector<8x320xf32> -> vector<16x320xf32>
    %cst_41 = arith.constant dense<0.000000e+00> : vector<16x320xf32>
    %68 = tpu.matmul %65, %3, %cst_41 {dimension_numbers = #tpu.dot_dimension_numbers<[1], [0], [0], [1], [0, 0, 1, 1], [], []>} : vector<16x32xf32>, vector<32x320xf32>, vector<16x320xf32> -> vector<16x320xf32>
    %69 = arith.addf %67, %68 : vector<16x320xf32>
    %70 = vector.broadcast %4 : vector<1x320xf32> to vector<16x320xf32>
    %71 = arith.addf %69, %70 : vector<16x320xf32>
    %cst_42 = arith.constant 0.000000e+00 : f32
    %72 = vector.broadcast %cst_42 : f32 to vector<16x320xf32>
    %73 = arith.maximumf %71, %72 : vector<16x320xf32>
    %74 = vector.extract_strided_slice %73 {offsets = [0, 0], sizes = [16, 128], strides = [1, 1]} : vector<16x320xf32> to vector<16x128xf32>
    %75 = vector.extract_strided_slice %73 {offsets = [0, 128], sizes = [16, 128], strides = [1, 1]} : vector<16x320xf32> to vector<16x128xf32>
    %76 = vector.extract_strided_slice %73 {offsets = [0, 256], sizes = [16, 64], strides = [1, 1]} : vector<16x320xf32> to vector<16x64xf32>
    %cst_43 = arith.constant dense<0.000000e+00> : vector<16x16xf32>
    %77 = tpu.matmul %74, %75, %cst_43 {dimension_numbers = #tpu.dot_dimension_numbers<[1], [1], [0], [0], [0, 0, 1, 0], [], []>} : vector<16x128xf32>, vector<16x128xf32>, vector<16x16xf32> -> vector<16x16xf32>
    %cst_44 = arith.constant dense<0xFF800000> : vector<16xf32>
    %78 = vector.multi_reduction <maximumf>, %77, %cst_44 [1] : vector<16x16xf32> to vector<16xf32>
    %79 = vector.shape_cast %78 : vector<16xf32> to vector<16x1xf32>
    %80 = vector.broadcast %79 : vector<16x1xf32> to vector<16x16xf32>
    %81 = arith.subf %77, %80 : vector<16x16xf32>
    %82 = math.exp %81 : vector<16x16xf32>
    %cst_45 = arith.constant dense<0.000000e+00> : vector<16xf32>
    %83 = vector.multi_reduction <add>, %82, %cst_45 [1] : vector<16x16xf32> to vector<16xf32>
    %84 = vector.shape_cast %83 : vector<16xf32> to vector<16x1xf32>
    %85 = tpu.reciprocal %84 : vector<16x1xf32> -> vector<16x1xf32>
    %86 = vector.broadcast %85 : vector<16x1xf32> to vector<16x16xf32>
    %87 = arith.mulf %82, %86 : vector<16x16xf32>
    %cst_46 = arith.constant dense<0.000000e+00> : vector<16x64xf32>
    %88 = tpu.matmul %87, %76, %cst_46 {dimension_numbers = #tpu.dot_dimension_numbers<[1], [0], [0], [1], [0, 0, 1, 1], [], []>} : vector<16x16xf32>, vector<16x64xf32>, vector<16x64xf32> -> vector<16x64xf32>
    %89 = tpu.concatenate %60, %60 in 0 : vector<8x32xf32>, vector<8x32xf32> -> vector<16x32xf32>
    %90 = tpu.concatenate %89, %65 in 1 : vector<16x32xf32>, vector<16x32xf32> -> vector<16x64xf32>
    %91 = arith.addf %90, %88 : vector<16x64xf32>
    %cst_47 = arith.constant dense<0.000000e+00> : vector<16x32xf32>
    %92 = tpu.matmul %91, %5, %cst_47 {dimension_numbers = #tpu.dot_dimension_numbers<[1], [0], [0], [1], [0, 0, 1, 1], [], []>} : vector<16x64xf32>, vector<64x32xf32>, vector<16x32xf32> -> vector<16x32xf32>
    %93 = vector.broadcast %6 : vector<1x32xf32> to vector<16x32xf32>
    %94 = arith.addf %92, %93 : vector<16x32xf32>
    %cst_48 = arith.constant 0.000000e+00 : f32
    %95 = vector.broadcast %cst_48 : f32 to vector<16x32xf32>
    %96 = arith.maximumf %94, %95 : vector<16x32xf32>
    %cst_49 = arith.constant dense<0.000000e+00> : vector<16x128xf32>
    %97 = tpu.matmul %96, %7, %cst_49 {dimension_numbers = #tpu.dot_dimension_numbers<[1], [0], [0], [1], [0, 0, 1, 1], [], []>} : vector<16x32xf32>, vector<32x128xf32>, vector<16x128xf32> -> vector<16x128xf32>
    %98 = vector.broadcast %8 : vector<1x128xf32> to vector<16x128xf32>
    %99 = arith.addf %97, %98 : vector<16x128xf32>
    %cst_50 = arith.constant 0.000000e+00 : f32
    %100 = vector.broadcast %cst_50 : f32 to vector<16x128xf32>
    %101 = arith.maximumf %99, %100 : vector<16x128xf32>
    %102 = arith.addf %53, %101 : vector<16x128xf32>
    %103 = vector.extract_strided_slice %102 {offsets = [0, 0], sizes = [16, 32], strides = [1, 1]} : vector<16x128xf32> to vector<16x32xf32>
    %c0_51 = arith.constant 0 : index
    %c0_52 = arith.constant 0 : index
    %c0_53 = arith.constant 0 : index
    %104 = vector.load %arg13[%c0_51, %c0_52, %c0_53] : memref<1x16x32xf32, #tpu.memory_space<vmem>>, vector<1x16x32xf32>
    %105 = vector.shape_cast %104 : vector<1x16x32xf32> to vector<16x32xf32>
    %106 = vector.shape_cast %103 : vector<16x32xf32> to vector<1x16x32xf32>
    tpu.vector_store %arg13[%c0_51, %c0_52, %c0_53], %106 {strides = array<i32>} : memref<1x16x32xf32, #tpu.memory_space<vmem>>, vector<1x16x32xf32>,
    return
  }
  func.func @transform_0(%arg0: i32) -> (i32, i32, i32) {
    %c0_i32 = arith.constant 0 : i32
    %c0_i32_0 = arith.constant 0 : i32
    %c0_i32_1 = arith.constant 0 : i32
    return %arg0, %c0_i32, %c0_i32_0 : i32, i32, i32
  }
  func.func @transform_1(%arg0: i32) -> (i32, i32) {
    %c0_i32 = arith.constant 0 : i32
    %c0_i32_0 = arith.constant 0 : i32
    %c0_i32_1 = arith.constant 0 : i32
    return %c0_i32, %c0_i32_0 : i32, i32
  }
  func.func @transform_2(%arg0: i32) -> (i32, i32) {
    %c0_i32 = arith.constant 0 : i32
    %c0_i32_0 = arith.constant 0 : i32
    %c0_i32_1 = arith.constant 0 : i32
    return %c0_i32, %c0_i32_0 : i32, i32
  }
  func.func @transform_3(%arg0: i32) -> (i32, i32) {
    %c0_i32 = arith.constant 0 : i32
    %c0_i32_0 = arith.constant 0 : i32
    %c0_i32_1 = arith.constant 0 : i32
    return %c0_i32, %c0_i32_0 : i32, i32
  }
  func.func @transform_4(%arg0: i32) -> (i32, i32) {
    %c0_i32 = arith.constant 0 : i32
    %c0_i32_0 = arith.constant 0 : i32
    %c0_i32_1 = arith.constant 0 : i32
    return %c0_i32, %c0_i32_0 : i32, i32
  }
  func.func @transform_5(%arg0: i32) -> (i32, i32) {
    %c0_i32 = arith.constant 0 : i32
    %c0_i32_0 = arith.constant 0 : i32
    %c0_i32_1 = arith.constant 0 : i32
    return %c0_i32, %c0_i32_0 : i32, i32
  }
  func.func @transform_6(%arg0: i32) -> (i32, i32) {
    %c0_i32 = arith.constant 0 : i32
    %c0_i32_0 = arith.constant 0 : i32
    %c0_i32_1 = arith.constant 0 : i32
    return %c0_i32, %c0_i32_0 : i32, i32
  }
  func.func @transform_7(%arg0: i32) -> (i32, i32) {
    %c0_i32 = arith.constant 0 : i32
    %c0_i32_0 = arith.constant 0 : i32
    %c0_i32_1 = arith.constant 0 : i32
    return %c0_i32, %c0_i32_0 : i32, i32
  }
  func.func @transform_8(%arg0: i32) -> (i32, i32) {
    %c0_i32 = arith.constant 0 : i32
    %c0_i32_0 = arith.constant 0 : i32
    %c0_i32_1 = arith.constant 0 : i32
    return %c0_i32, %c0_i32_0 : i32, i32
  }
  func.func @transform_9(%arg0: i32) -> (i32, i32) {
    %c0_i32 = arith.constant 0 : i32
    %c0_i32_0 = arith.constant 0 : i32
    %c0_i32_1 = arith.constant 0 : i32
    return %c0_i32, %c0_i32_0 : i32, i32
  }
  func.func @transform_10(%arg0: i32) -> (i32, i32) {
    %c0_i32 = arith.constant 0 : i32
    %c0_i32_0 = arith.constant 0 : i32
    %c0_i32_1 = arith.constant 0 : i32
    return %c0_i32, %c0_i32_0 : i32, i32
  }
  func.func @transform_11(%arg0: i32) -> (i32, i32) {
    %c0_i32 = arith.constant 0 : i32
    %c0_i32_0 = arith.constant 0 : i32
    %c0_i32_1 = arith.constant 0 : i32
    return %c0_i32, %c0_i32_0 : i32, i32
  }
  func.func @transform_12(%arg0: i32) -> (i32, i32, i32) {
    %c0_i32 = arith.constant 0 : i32
    %c0_i32_0 = arith.constant 0 : i32
    %c0_i32_1 = arith.constant 0 : i32
    return %arg0, %c0_i32, %c0_i32_0 : i32, i32, i32
  }
}

</mosaic_0001>

<bundles_post_ra>
// kernel: _lambda_.1
= control target key start
LH: loop header
LB: loop body
LE: loop exit
PB: predicated region body
PF: predicated region fallthrough
CT: control target
= control target key end

     0   :  { %s4047_s0 = inlined_call_operand.hbm [shape: f32[2,8,32], index: 0, kind: input, shape index: {}]   ;;  %s4048_s1 = inlined_call_operand.hbm [shape: f32[32,32], index: 1, kind: input, shape index: {}]   ;;  %s4049_s2 = inlined_call_operand.hbm [shape: f32[16,32], index: 2, kind: input, shape index: {}]   ;;  %s4050_s3 = inlined_call_operand.hbm [shape: f32[32,320], index: 3, kind: input, shape index: {}]   ;;  %s4051_s4 = inlined_call_operand.hbm [shape: f32[32,320], index: 4, kind: input, shape index: {}]   ;;  %s4052_s5 = inlined_call_operand.vmem [shape: f32[1,320], index: 5, kind: input, shape index: {}]   ;;  %s4053_s6 = inlined_call_operand.hbm [shape: f32[64,32], index: 6, kind: input, shape index: {}]   ;;  %s4054_s7 = inlined_call_operand.vmem [shape: f32[1,32], index: 7, kind: input, shape index: {}]   ;;  %s4055_s8 = inlined_call_operand.hbm [shape: f32[32,128], index: 8, kind: input, shape index: {}]   ;;  %s4056_s9 = inlined_call_operand.vmem [shape: f32[1,128], index: 9, kind: input, shape index: {}]   ;;  %s4057_s10 = inlined_call_operand.hbm [shape: f32[256,32], index: 10, kind: input, shape index: {}]   ;;  %s4058_s11 = inlined_call_operand.vmem [shape: f32[1,32], index: 11, kind: input, shape index: {}]   ;;  %s4059_s12 = inlined_call_operand.hbm [shape: f32[2,16,32], index: 12, kind: output, shape index: {}]  }
   0x1   :  { %4070 = sst [smem:[#allocation23_spill]] %s4048_s1 }
   0x2   :  { %4071 = sst [smem:[#allocation24_spill]] %s4049_s2 }
   0x3   :  { %4072 = sst [smem:[#allocation25_spill]] %s4054_s7 }
   0x4   :  { %4073 = sst [smem:[#allocation26_spill]] %s4056_s9 }
   0x5   :  { %4074 = sst [smem:[#allocation27_spill]] %s4058_s11 }
   0x6   :  { %4075 = sst [smem:[#allocation28_spill]] %s4059_s12 }
   0x7   :  { %17 = vsyncpa [#allocation3], 0 }
   0x8   :  { %19 = vsyncpa [#allocation3 + $0x1], 0 }
   0x9   :  { %20 = vsyncpa [#allocation6], 0 }
   0xa   :  { %21 = vsyncpa [#allocation9], 0 }
   0xb   :  { %22 = vsyncpa [#allocation12], 0 }
   0xc   :  { %23 = vsyncpa [#allocation15], 0 }
   0xd   :  { %24 = vsyncpa [#allocation4], 0 }
   0xe   :  { %26 = vsyncpa [#allocation4 + $0x1], 0  ;;  %s3426_s21 = smov 0   ;;  %s3428_s22 = smov 0  }
   0xf   :  { %s3430_s23 = smov 0   ;;  %s3432_s24 = smov 0  }
  0x10 LB: > { %s3341_s25 = smov [#allocation5]   ;;  %s3447_s27 = sadd.s32 4294967295, %s3339_s24   ;;  %s3339_s24 = sphi %s3432_s24, %s4109_s24   ;;  %s3335_s23 = sphi %s3430_s23, %s4108_s23   ;;  %s3331_s22 = sphi %s3428_s22, %s4107_s22   ;;  %s3327_s21 = sphi %s3426_s21, %s4106_s21  }
  0x11   : > { %s332_s26 = sshll.u32 %s3341_s25, 4  ;;  %p2394_p0 = scmp.ge.s32.totalorder %s3339_s24, 1  ;;  %s3452_s26 = int_to_ptr.vmem [resolvable:$true] %s332_s26 }
  0x12   : > { %p4063_p1 = scmp.eq.s32.totalorder %s3447_s27, 0  ;;  %p320_p2 = scmp.lt.s32.totalorder %s3339_s24, 3 }
  0x13   : > { %s3342_s29 = smov [#allocation8]   ;;  %s3343_s14 = smov [#allocation11]  }
  0x14   : > { %p3454_p3 = pnand %p2394_p0, %p320_p2  ;;  %s358_s30 = sshll.u32 %s3342_s29, 4  ;;  %s3467_s30 = int_to_ptr.vmem [resolvable:$true] %s358_s30 }
  0x15   : > { %s3469_s15 = sshll.u32 %s3343_s14, 4  ;;  %s4078_s1 = sld [smem:[#allocation23_spill]]  ;;  %s388_s15 = int_to_ptr.vmem [resolvable:$true] %s3469_s15 }
  0x16   : > { %s4076_s28 = scalar_select %p3454_p3, 1, 0 }
  0x17   : > { %p2919_p5 = pneg %p3454_p3 }
  0x19   : > { %p3463_p6 = pnand %p2919_p5, %p4063_p1 }
  0x1b   : > { %s3031_s18 = scalar_lea.hbm %s4078_s1, 512  ;;  %p3479_p8 = pneg %p3463_p6 }
  0x1c   : > { %p3032_p7 = scmp.ne.s32.totalorder %s4078_s1, %s3031_s18  ;;  %p3038_p11 = scmp.lt.u32.totalorder %s3031_s18, %s4078_s1 }
  0x1e   : > { %p3034_p9 = pnand %p3479_p8, %p3032_p7 }
  0x20   : > { %p3035_p10 = pneg %p3034_p9 }
  0x22   : > { %p3040_p12 = pnand %p3038_p11, %p3035_p10 }
  0x24   : > { %3043 = shalt.err (!%p3040_p12)
}
  0x25   : > { %s3044_s16 = scalar_lea.vmem %s3452_s26, 512  ;;  %p3052_p5 = scmp.lt.s32.totalorder %s3452_s26, %s3452_s26 }
  0x26   : > { %p3045_p13 = scmp.ne.s32.totalorder %s3452_s26, %s3044_s16  ;;  %p3053_p4 = scmp.lt.s32.totalorder %s3044_s16, %s3044_s16 }
  0x28   : > { %p3047_p0 = pnand %p3045_p13, %p3479_p8  ;;  %p3054_p7 = por %p3053_p4, %p3052_p5 }
  0x2a   : > { %p3048_p2 = pneg %p3047_p0 }
  0x2c   : > { %p3055_p9 = pnand %p3054_p7, %p3048_p2 }
  0x2e   : > { %3058 = shalt.err (!%p3055_p9)
}
  0x2f   : > { %s4061_s17 = smov 128   ;;  %s4067_s18 = smov 8  }
  0x30   : > { %2922 = dma.hbm_to_vmem [thread:$0]  (!%p3463_p6), %s4078_s1, 512, %s3452_s26, [#allocation6], %s4061_s17, %s4061_s17, %s4067_s18  }
  0x31   : > { %s3059_s16 = scalar_lea.hbm %s4050_s3, 1536 }
  0x32   : > { %p3060_p4 = scmp.ne.s32.totalorder %s4050_s3, %s3059_s16  ;;  %p3066_p12 = scmp.lt.u32.totalorder %s3059_s16, %s4050_s3 }
  0x34   : > { %p3062_p10 = pnand %p3060_p4, %p3479_p8 }
  0x36   : > { %p3063_p11 = pneg %p3062_p10 }
  0x38   : > { %p3068_p13 = pnand %p3066_p12, %p3063_p11 }
  0x3a   : > { %3071 = shalt.err (!%p3068_p13)
}
  0x3b   : > { %s3072_s26 = scalar_lea.vmem %s3467_s30, 1536  ;;  %p3080_p7 = scmp.lt.s32.totalorder %s3467_s30, %s3467_s30 }
  0x3c   : > { %p3073_p0 = scmp.ne.s32.totalorder %s3467_s30, %s3072_s26  ;;  %p3081_p9 = scmp.lt.s32.totalorder %s3072_s26, %s3072_s26 }
  0x3e   : > { %p3075_p2 = pnand %p3073_p0, %p3479_p8  ;;  %p3082_p4 = por %p3081_p9, %p3080_p7 }
  0x40   : > { %p3076_p5 = pneg %p3075_p2 }
  0x42   : > { %p3083_p10 = pnand %p3082_p4, %p3076_p5 }
  0x44   : > { %3086 = shalt.err (!%p3083_p10)
}
  0x45   : > { %s4065_s11 = smov 384   ;;  %s4066_s7 = smov 24  }
  0x46   : > { %2928 = dma.hbm_to_vmem [thread:$0]  (!%p3463_p6), %s4050_s3, 1536, %s3467_s30, [#allocation9], %s4065_s11, %s4065_s11, %s4066_s7  }
  0x47   : > { %s3087_s29 = scalar_lea.hbm %s4053_s6, 1024 }
  0x48   : > { %p3088_p11 = scmp.ne.s32.totalorder %s4053_s6, %s3087_s29  ;;  %p3094_p0 = scmp.lt.u32.totalorder %s3087_s29, %s4053_s6 }
  0x4a   : > { %p3090_p12 = pnand %p3088_p11, %p3479_p8 }
  0x4c   : > { %p3091_p13 = pneg %p3090_p12 }
  0x4e   : > { %p3096_p2 = pnand %p3094_p0, %p3091_p13 }
  0x50   : > { %3099 = shalt.err (!%p3096_p2)
}
  0x51   : > { %s3100_s9 = scalar_lea.vmem %s388_s15, 1024  ;;  %p3108_p4 = scmp.lt.s32.totalorder %s388_s15, %s388_s15 }
  0x52   : > { %p3101_p5 = scmp.ne.s32.totalorder %s388_s15, %s3100_s9  ;;  %p3109_p10 = scmp.lt.s32.totalorder %s3100_s9, %s3100_s9 }
  0x54   : > { %p3103_p7 = pnand %p3101_p5, %p3479_p8  ;;  %p3110_p1 = por %p3109_p10, %p3108_p4 }
  0x56   : > { %p3104_p9 = pneg %p3103_p7 }
  0x58   : > { %p3111_p3 = pnand %p3110_p1, %p3104_p9 }
  0x5a   : > { %3114 = shalt.err (!%p3111_p3)
}
  0x5b   : > { %s4080_s30 = smov 128   ;;  %s3348_s19 = smov [#allocation7]  }
  0x5c   : > { %2934 = dma.hbm_to_vmem [thread:$0]  (!%p3463_p6), %s4053_s6, 1024, %s388_s15, [#allocation12], %s4080_s30, %s4080_s30, %s4067_s18  }
  0x5d   : > { %s345_s20 = sshll.u32 %s3348_s19, 4  ;;  %s3349_s29 = smov [#allocation10]   ;;  %s346_s20 = int_to_ptr.vmem [resolvable:$true] %s345_s20 }
  0x5e   : > { %s371_s14 = sshll.u32 %s3349_s29, 4  ;;  %s4081_s2 = sld [smem:[#allocation24_spill]]  ;;  %s372_s14 = int_to_ptr.vmem [resolvable:$true] %s371_s14 }
  0x64   : > { %s3115_s9 = scalar_lea.hbm %s4081_s2, 256 }
  0x65   : > { %p3116_p1 = scmp.ne.s32.totalorder %s4081_s2, %s3115_s9  ;;  %p3122_p12 = scmp.lt.u32.totalorder %s3115_s9, %s4081_s2 }
  0x67   : > { %p3118_p3 = pnand %p3116_p1, %p3479_p8 }
  0x69   : > { %p3119_p11 = pneg %p3118_p3 }
  0x6b   : > { %p3124_p13 = pnand %p3122_p12, %p3119_p11 }
  0x6d   : > { %3127 = shalt.err (!%p3124_p13)
}
  0x6e   : > { %s3128_s15 = scalar_lea.vmem %s346_s20, 256  ;;  %p3136_p7 = scmp.lt.s32.totalorder %s346_s20, %s346_s20 }
  0x6f   : > { %p3129_p0 = scmp.ne.s32.totalorder %s346_s20, %s3128_s15  ;;  %p3137_p9 = scmp.lt.s32.totalorder %s3128_s15, %s3128_s15 }
  0x71   : > { %p3131_p2 = pnand %p3129_p0, %p3479_p8  ;;  %p3138_p4 = por %p3137_p9, %p3136_p7 }
  0x73   : > { %p3132_p5 = pneg %p3131_p2 }
  0x75   : > { %p3139_p10 = pnand %p3138_p4, %p3132_p5 }
  0x77   : > { %3142 = shalt.err (!%p3139_p10)
}
  0x78   : > { %2925 = dma.hbm_to_vmem [thread:$0]  (!%p3463_p6), %s4081_s2, 256, %s346_s20, [#allocation6], %s4080_s30, %s4080_s30, %s4067_s18  }
  0x79   : > { %s3143_s19 = scalar_lea.hbm %s4051_s4, 1536 }
  0x7a   : > { %p3144_p1 = scmp.ne.s32.totalorder %s4051_s4, %s3143_s19  ;;  %p3150_p12 = scmp.lt.u32.totalorder %s3143_s19, %s4051_s4 }
  0x7c   : > { %p3146_p3 = pnand %p3144_p1, %p3479_p8 }
  0x7e   : > { %p3147_p11 = pneg %p3146_p3 }
  0x80   : > { %p3152_p13 = pnand %p3150_p12, %p3147_p11 }
  0x82   : > { %3155 = shalt.err (!%p3152_p13)
}
  0x83   : > { %s3156_s17 = scalar_lea.vmem %s372_s14, 1536  ;;  %p3164_p7 = scmp.lt.s32.totalorder %s372_s14, %s372_s14 }
  0x84   : > { %p3157_p0 = scmp.ne.s32.totalorder %s372_s14, %s3156_s17  ;;  %p3165_p9 = scmp.lt.s32.totalorder %s3156_s17, %s3156_s17 }
  0x86   : > { %p3159_p2 = pnand %p3157_p0, %p3479_p8  ;;  %p3166_p4 = por %p3165_p9, %p3164_p7 }
  0x88   : > { %p3160_p5 = pneg %p3159_p2 }
  0x8a   : > { %p3167_p10 = pnand %p3166_p4, %p3160_p5 }
  0x8c   : > { %3170 = shalt.err (!%p3167_p10)
}
  0x8d   : > { %s4082_s20 = smov 24   ;;  %s4083_s15 = smov 384  }
  0x8e   : > { %2931 = dma.hbm_to_vmem [thread:$0]  (!%p3463_p6), %s4051_s4, 1536, %s372_s14, [#allocation9], %s4083_s15, %s4083_s15, %s4082_s20  }
  0x8f   : > { %s3350_s7 = smov [#allocation13]   ;;  %s3351_s19 = smov [#allocation14]  }
  0x90   : > { %s403_s12 = sshll.u32 %s3350_s7, 4  ;;  %s419_s29 = sshll.u32 %s3351_s19, 4  ;;  %s404_s12 = int_to_ptr.vmem [resolvable:$true] %s403_s12  ;;  %s420_s29 = int_to_ptr.vmem [resolvable:$true] %s419_s29 }
  0x91   : > { %s3171_s9 = scalar_lea.hbm %s4055_s8, 512 }
  0x92   : > { %p3172_p1 = scmp.ne.s32.totalorder %s4055_s8, %s3171_s9  ;;  %p3178_p12 = scmp.lt.u32.totalorder %s3171_s9, %s4055_s8 }
  0x94   : > { %p3174_p3 = pnand %p3172_p1, %p3479_p8 }
  0x96   : > { %p3175_p11 = pneg %p3174_p3 }
  0x98   : > { %p3180_p13 = pnand %p3178_p12, %p3175_p11 }
  0x9a   : > { %3183 = shalt.err (!%p3180_p13)
}
  0x9b   : > { %s3184_s14 = scalar_lea.vmem %s404_s12, 512  ;;  %p3192_p7 = scmp.lt.s32.totalorder %s404_s12, %s404_s12 }
  0x9c   : > { %p3185_p0 = scmp.ne.s32.totalorder %s404_s12, %s3184_s14  ;;  %p3193_p9 = scmp.lt.s32.totalorder %s3184_s14, %s3184_s14 }
  0x9e   : > { %p3187_p2 = pnand %p3185_p0, %p3479_p8  ;;  %p3194_p4 = por %p3193_p9, %p3192_p7 }
  0xa0   : > { %p3188_p5 = pneg %p3187_p2 }
  0xa2   : > { %p3195_p10 = pnand %p3194_p4, %p3188_p5 }
  0xa4   : > { %3198 = shalt.err (!%p3195_p10)
}
  0xa5   : > { %s4084_s18 = smov 8   ;;  %s3199_s7 = scalar_lea.hbm %s4057_s10, 4096 }
  0xa6   : > { %2937 = dma.hbm_to_vmem [thread:$0]  (!%p3463_p6), %s4055_s8, 512, %s404_s12, [#allocation12], %s4080_s30, %s4080_s30, %s4084_s18  }
  0xa7   : > { %p3200_p1 = scmp.ne.s32.totalorder %s4057_s10, %s3199_s7  ;;  %p3206_p12 = scmp.lt.u32.totalorder %s3199_s7, %s4057_s10 }
  0xa9   : > { %p3202_p3 = pnand %p3200_p1, %p3479_p8 }
  0xab   : > { %p3203_p11 = pneg %p3202_p3 }
  0xad   : > { %p3208_p13 = pnand %p3206_p12, %p3203_p11 }
  0xaf   : > { %3211 = shalt.err (!%p3208_p13)
}
  0xb0   : > { %s3212_s17 = scalar_lea.vmem %s420_s29, 4096  ;;  %p3220_p7 = scmp.lt.s32.totalorder %s420_s29, %s420_s29 }
  0xb1   : > { %p3213_p0 = scmp.ne.s32.totalorder %s420_s29, %s3212_s17  ;;  %p3221_p9 = scmp.lt.s32.totalorder %s3212_s17, %s3212_s17 }
  0xb3   : > { %p3215_p2 = pnand %p3213_p0, %p3479_p8  ;;  %p3222_p4 = por %p3221_p9, %p3220_p7 }
  0xb5   : > { %p3216_p5 = pneg %p3215_p2 }
  0xb7   : > { %p3223_p10 = pnand %p3222_p4, %p3216_p5 }
  0xb9   : > { %3226 = shalt.err (!%p3223_p10)
}
  0xba   : > { %2940 = dma.hbm_to_vmem [thread:$0]  (!%p3463_p6), %s4057_s10, 4096, %s420_s29, [#allocation15], %s4080_s30, %s4080_s30, %s4084_s18  }
  0xbb   : > { %s2393_s13 = sadd.s32 4294967294, %s3339_s24   ;;  %s3637_s25 = sadd.s32 1, %s3339_s24  }
  0xbc   : > { %s39_s14 = sadd.s32 1, %s3335_s23  ;;  %s36_s2 = ssub.s32 %s3339_s24, %s3637_s25 }
  0xbd   : > { %p46_p8 = scmp.ne.s32.totalorder %s3335_s23, %s3331_s22  ;;  %p37_p1 = scmp.eq.s32.totalorder %s36_s2, 0 }
  0xbe   : > { %p47_p3 = scmp.eq.s32.totalorder %s3339_s24, 0  ;;  %p52_p11 = scmp.ne.s32.totalorder %s3331_s22, %s3327_s21 }
  0xbf   : > { %p307_p12 = scmp.eq.s32.totalorder %s3447_s27, 1  ;;  %p4085_p0 = scmp.eq.s32.totalorder %s3447_s27, 0 }
  0xc0   : > { %s3649_s20 = scalar_select %p37_p1, %s3335_s23, %s39_s14  }
  0xc1   : > { %p48_p13 = por %p47_p3, %p46_p8  ;;  %p3653_p2 = por %p4085_p0, %p52_p11 }
  0xc2   : > { %p3657_p6 = por %p307_p12, %p46_p8  ;;  %p313_p5 = scmp.eq.s32.totalorder %s2393_s13, 1 }
  0xc3   : > { %p2956_p7 = scmp.lt.s32.totalorder %s3339_s24, 2  ;;  %s436_s29 = sand.u32 1, %s3335_s23  }
  0xc4   : > { %s4087_s30 = scalar_select %p3657_p6, 1, 0 }
  0xc5   : > { %p3663_p9 = por %p313_p5, %p52_p11  ;;  %s2403_s11 = sshll.u32 %s436_s29, 3 }
  0xc6   : > { %s2404_s7 = sshll.u32 %s3339_s24, 7  ;;  %s440_s9 = scalar_lea.vmem [#allocation2], %s2403_s11 }
  0xc7   : > { %s4088_s18 = scalar_select %p3663_p9, 1, 0 }
  0xc8   : > { %s3671_s26 = scalar_lea.hbm %s4047_s0, %s2404_s7  ;;  %s447_s17 = sshll.u32 %s440_s9, 4  ;;  %s3677_s17 = int_to_ptr.vmem [resolvable:$true] %s447_s17 }
  0xc9   : > { %p3673_p4 = pnand %p2956_p7, %p48_p13  ;;  %s437_s1 = scalar_lea.sflag [#allocation3], %s436_s29 }
  0xca   : > { %s3227_s13 = scalar_lea.hbm %s3671_s26, 128  ;;  %s3232_s11 = scalar_lea.hbm %s4047_s0, 256 }
  0xcb   : > { %p3228_p10 = scmp.ne.s32.totalorder %s3671_s26, %s3227_s13  ;;  %p3229_p8 = pneg %p3673_p4 }
  0xcc   : > { %p3233_p11 = scmp.lt.u32.totalorder %s3671_s26, %s4047_s0  ;;  %p3234_p12 = scmp.lt.u32.totalorder %s3232_s11, %s3227_s13 }
  0xcd   : > { %p3230_p1 = pnand %p3229_p8, %p3228_p10  ;;  %p3236_p0 = scmp.lt.u32.totalorder %s3227_s13, %s3671_s26 }
  0xce   : > { %p3235_p13 = por %p3234_p12, %p3233_p11 }
  0xcf   : > { %p3231_p3 = pneg %p3230_p1 }
  0xd0   : > { %p3237_p5 = por %p3236_p0, %p3235_p13 }
  0xd2   : > { %p3238_p7 = pnand %p3237_p5, %p3231_p3 }
  0xd4   : > { %3241 = shalt.err (!%p3238_p7)
}
  0xd5   : > { %s3242_s29 = scalar_lea.vmem %s3677_s17, 128  ;;  %s3352_s16 = smov [#allocation2]  }
  0xd6   : > { %p3243_p10 = scmp.ne.s32.totalorder %s3677_s17, %s3242_s29  ;;  %s3247_s9 = sshll.u32 %s3352_s16, 4  ;;  %s3248_s9 = int_to_ptr.vmem [resolvable:$false] %s3247_s9 }
  0xd7   : > { %s3249_s14 = scalar_lea.vmem %s3248_s9, 256  ;;  %p3250_p6 = scmp.lt.s32.totalorder %s3677_s17, %s3248_s9 }
  0xd8   : > { %p3245_p1 = pnand %p3243_p10, %p3229_p8  ;;  %p3251_p11 = scmp.lt.s32.totalorder %s3249_s14, %s3242_s29 }
  0xda   : > { %p3246_p9 = pneg %p3245_p1  ;;  %p3252_p12 = por %p3251_p11, %p3250_p6 }
  0xdc   : > { %p3253_p13 = pnand %p3252_p12, %p3246_p9 }
  0xde   : > { %3256 = shalt.err (!%p3253_p13)
}
  0xdf   : > { %2944 = dma.hbm_to_vmem [thread:$0]  (!%p3673_p4), %s3671_s26, 128, %s3677_s17, %s437_s1  }
  0xe0   : > { %p4090_p3 = scmp.ne.s32.totalorder %s4076_s28, 0 }
  0xe1   : > { %s3707_s13 = sand.u32 (!%p4090_p3), 1, %s3331_s22  }
  0xe2   : > { %456 = sbr.rel (%p4090_p3) target bundleno = 3758 (0xeae), region = 68  ;;  %s2406_s2 = sshll.u32 (!%p4090_p3), %s3707_s13, 3 }
  0xe3   : > { %s459_s11 = scalar_lea.sflag (!%p4090_p3), [#allocation3], %s3707_s13  ;;  %s3711_s7 = scalar_lea.vmem (!%p4090_p3), [#allocation2], %s2406_s2 }
  0xe9   : > { %3302 = dma.done.wait (%p3653_p2), %s459_s11, 128  }
  0xea   : > { %3304 = vsyncadd (%p3653_p2), %s459_s11, 4294967168  ;;  %p4091_p6 = scmp.eq.s32.totalorder %s3447_s27, 0 }
  0xec   : > { %3306 = dma.done.wait (%p4091_p6), [#allocation6], 768   ;;  %p4092_p9 = pmov %p4091_p6 }
  0xed   : > { %p4093_p4 = pmov %p4091_p6 }
  0xee   : > { %3308 = vsyncadd (%p4092_p9), [#allocation6], 4294966528 }
  0xef   : > { %3310 = dma.done.wait (%p4093_p4), [#allocation9], 3072   ;;  %p4094_p8 = pmov %p4093_p4 }
  0xf0   : > { %p4095_p0 = pmov %p4093_p4 }
  0xf1   : > { %3312 = vsyncadd (%p4094_p8), [#allocation9], 4294964224 }
  0xf2   : > { %3314 = dma.done.wait (%p4095_p0), [#allocation12], 1536   ;;  %p4096_p5 = pmov %p4095_p0 }
  0xf3   : > { %p4097_p2 = pmov %p4095_p0 }
  0xf4   : > { %3316 = vsyncadd (%p4096_p5), [#allocation12], 4294965760 }
  0xf5   : > { %3318 = dma.done.wait (%p4097_p2), [#allocation15], 4096   ;;  %p4098_p7 = pmov %p4095_p0 }
  0xf6   : > { %v3353_v0 = vmov 0.0|0.0   ;;  %vm3354_vm0 = vmmov 0   ;;  %v3355_v1 = vmov 0.0   ;;  %v531_v2 = vld [vmem:[#allocation5] sm:$0xff]  ;;  %v532_v3 = vld [vmem:[#allocation5 + $0x8] sm:$0xff]  ;;  %v533_v4 = vld [vmem:[#allocation5 + $0x10] sm:$0xff]  ;;  %v994_v57 = vlaneseq }
  0xf7   : > { %3320 = vsyncadd (%p4098_p7), [#allocation15], 4294963200  ;;  %2719 = vmatprep.subr.bf16.mxu0 %v3353_v0  ;;  %2573 = vmatprep.mubr.msk.f32.mxu0 %vm3354_vm0, %v3355_v1  ;;  %v3737_v5 = vpack.c.bf16 %v532_v3, %v531_v2  ;;  %v534_v6 = vld [vmem:[#allocation5 + $0x18] sm:$0xff]  ;;  %v541_v8 = vld [vmem:[#allocation8 + $0x20] sm:$0xff]  ;;  %vm610_vm1 = vcmask 261120   ;;  %vm1096_vm2 = vcmask 130048  }
  0xf8   : > { %752 = vmatprep.mubr.f32.mxu1 %v3355_v1  ;;  %v538_v7 = vld [vmem:[#allocation8 + $0x8] sm:$0xff]  ;;  %v537_v9 = vld [vmem:[#allocation8] sm:$0xff]  ;;  %v540_v10 = vld [vmem:[#allocation8 + $0x18] sm:$0xff]  ;;  %v3740_v11 = vpack.c.bf16 %v534_v6, %v533_v4  ;;  %v3811_v58 = vshrl.u32 %v994_v57, 7  ;;  %s3356_s26 = smov 32   ;;  %vm1216_vm3 = vcmask 523264  }
  0xf9   : > { %2721 = vmatpush3.bf16.msra.mxu0 %v3737_v5  ;;  %v3742_v12 = vpack.c.bf16 %v541_v8, %v538_v7  ;;  %v3744_v13 = vpack.c.bf16 %v540_v10, %v537_v9  ;;  %v539_v14 = vld [vmem:[#allocation8 + $0x10] sm:$0xff]  ;;  %v542_v15 = vld [vmem:[#allocation8 + $0x28] sm:$0xff]  ;;  %v544_v16 = vld [vmem:[#allocation8 + $0x38] sm:$0xff]  ;;  %s4099_s1 = sld [smem:[#allocation25_spill]]  ;;  %s4100_s16 = sld [smem:[#allocation26_spill]] }
  0xfa   : > { %2722 = vmatprep.subr.bf16.mxu0 %v3353_v0  ;;  %v547_v17 = vld [vmem:[#allocation8 + $0x50] sm:$0xff]  ;;  %v546_v19 = vld [vmem:[#allocation8 + $0x48] sm:$0xff]  ;;  %v553_v23 = vld [vmem:[#allocation10 + $0x20] sm:$0xff]  ;;  %v3757_v25 = vpack.c.bf16 %v542_v15, %v539_v14  ;;  %v996_v59 = vsub.s32 0, %v3811_v58  ;;  %v1004_v61 = vsub.s32 2, %v3811_v58  ;;  %v1000_v62 = vsub.s32 1, %v3811_v58 }
  0xfb   : > { %v543_v18 = vld [vmem:[#allocation8 + $0x30] sm:$0xff]  ;;  %2726 = vmatprep.subr.bf16.mxu1 %v3742_v12  ;;  %v3748_v20 = vpack.c.bf16 %v547_v17, %v544_v16  ;;  %v550_v21 = vld [vmem:[#allocation10 + $0x8] sm:$0xff]  ;;  %v549_v27 = vld [vmem:[#allocation10] sm:$0xff]  ;;  %s4101_s2 = sld [smem:[#allocation27_spill]]  ;;  %s2414_s11 = sshll.u32 %s3707_s13, 4 }
  0xfc   : > { %2728 = vmatpush1.bf16.msra.mxu1 %v3744_v13  ;;  %v3751_v22 = vpack.c.bf16 %v546_v19, %v543_v18  ;;  %v3755_v24 = vld [vmem:[%s3711_s7] sm:$0xff]  ;;  %v3760_v26 = vpack.c.bf16 %v553_v23, %v550_v21  ;;  %v552_v28 = vld [vmem:[#allocation10 + $0x18] sm:$0xff]  ;;  %v551_v31 = vld [vmem:[#allocation10 + $0x10] sm:$0xff]  ;;  %s2449_s7 = sshll.u32 %s3447_s27, 8  ;;  %s530_s28 = scalar_lea.vmem [#allocation16], %s2414_s11 }
  0xfd   : > { %2724 = vmatpush3.bf16.msra.mxu0 %v3740_v11  ;;  %2730 = vmatprep.subr.bf16.mxu1 %v3748_v20  ;;  %v545_v29 = vld [vmem:[#allocation8 + $0x40] sm:$0xff]  ;;  %v548_v30 = vld [vmem:[#allocation8 + $0x58] sm:$0xff]  ;;  %v554_v32 = vld [vmem:[#allocation10 + $0x28] sm:$0xff]  ;;  %v3766_v33 = vpack.c.bf16 %v552_v28, %v549_v27  ;;  %s2253_s15 = sshll.u32 %s530_s28, 4  ;;  %s4102_s12 = sld [smem:[#allocation28_spill]]  ;;  %s3999_s15 = int_to_ptr.vmem [resolvable:$true] %s2253_s15 }
  0xfe   : > { %2733 = vmatprep.subr.bf16.mxu0 %v3353_v0  ;;  %v3769_v34 = vpack.c.bf16 %v548_v30, %v545_v29  ;;  %v3775_v35 = vpack.c.bf16 %v554_v32, %v551_v31  ;;  %v556_v36 = vld [vmem:[#allocation10 + $0x38] sm:$0xff]  ;;  %v559_v37 = vld [vmem:[#allocation10 + $0x50] sm:$0xff]  ;;  %v558_v40 = vld [vmem:[#allocation10 + $0x48] sm:$0xff]  ;;  %s2240_s27 = scalar_lea.sflag [#allocation4], %s3707_s13  ;;  %s3257_s19 = scalar_lea.vmem %s3999_s15, 256 }
  0xff   : > { %v3786_v38 = vpack.c.bf16 %v559_v37, %v556_v36  ;;  %v555_v39 = vld [vmem:[#allocation10 + $0x30] sm:$0xff]  ;;  %v557_v41 = vld [vmem:[#allocation10 + $0x40] sm:$0xff]  ;;  %v560_v43 = vld [vmem:[#allocation10 + $0x58] sm:$0xff]  ;;  %p3258_p10 = scmp.ne.s32.totalorder %s3999_s15, %s3257_s19  ;;  %p4103_p1 = scmp.ne.s32.totalorder %s4087_s30, 0 }
 0x100   : > { %2574 = vmatmul.mubr.msk.f32.vlgmr.msra.gmra.mrb[0].mxu0 %vm610_vm1, %v3755_v24  ;;  %2732 = vmatpush1.bf16.msra.mxu1 %v3751_v22  ;;  %v3788_v42 = vpack.c.bf16 %v558_v40, %v555_v39  ;;  %v3791_v44 = vpack.c.bf16 %v560_v43, %v557_v41  ;;  %v3796_v45 = vld [vmem:[#allocation7] sm:$0xff]  ;;  %v3798_v46 = vld [vmem:[#allocation7 + $0x8] sm:$0xff]  ;;  %v561_v60 = vld [vmem:[%s4052_s5] sm:$0x7]  ;;  %s3358_s29 = smov [#allocation16]  }
 0x101   : > { %2735 = vmatpush3.bf16.msra.mxu0 %v3757_v25  ;;  %2740 = vmatprep.subr.bf16.mxu1 %v3760_v26  ;;  %v3819_v63 = vrot.slane %v561_v60, %v996_v59  ;;  %v3821_v3 = vrot.slane %v561_v60, %v1004_v61  ;;  %v3823_v9 = vrot.slane %v561_v60, %v1000_v62  ;;  %p3259_p11 = pnand %p3258_p10, %p4103_p1 }
 0x102   : > { %2736 = vmatprep.subr.bf16.mxu0 %v3353_v0  ;;  %2584 = vmatprep.mubr.msk.f32.mxu0 %vm3354_vm0, %v3355_v1 }
 0x103   : > { %2416 = vmatmul.mubr.msk.f32.vlgmr.msra.gmra.mrb[0].mxu1 %vm610_vm1, %v3755_v24  ;;  %p3260_p12 = pneg %p3259_p11 }
 0x104   : > { %2742 = vmatpush1.bf16.msra.mxu1 %v3766_v33  ;;  %899 = vmatprep.mubr.f32.mxu1 %v3355_v1 }
 0x105   : > { %2738 = vmatpush3.bf16.msra.mxu0 %v3769_v34  ;;  %2744 = vmatprep.subr.bf16.mxu1 %v3786_v38 }
 0x106   : > { %2748 = vmatprep.subr.bf16.mxu0 %v3775_v35 }
 0x108   : > { %2585 = vmatmul.mubr.msk.f32.vlgmr.msra.gmra.mrb[2].mxu0 %vm610_vm1, %v3755_v24  ;;  %2746 = vmatpush1.bf16.msra.mxu1 %v3788_v42 }
 0x109   : > { %2750 = vmatpush3.bf16.msra.mxu0 %v3775_v35 }
 0x10a   : > { %2752 = vmatprep.subr.bf16.mxu0 %v3791_v44 }
 0x10d   : > { %2754 = vmatpush3.bf16.msra.mxu0 %v3791_v44 }
 0x1d3   : > { %v680_v47 = vpop.f32.mrb[0].mxu0 }
 0x1d4   : > { %v684_v48 = vadd.f32 %v680_v47, %v3796_v45  ;;  %v685_v49 = vadd.f32 %v680_v47, %v3798_v46  ;;  %v2575_v50 = vpop.f32.mrb[1].mxu0 }
 0x1d6   : > { %v686_v51 = vmax.f32 %v684_v48, 0.0  ;;  %v3802_v52 = vmax.f32 %v685_v49, 0.0  ;;  %v754_v53 = vpop.f32.mrb[0].mxu1 }
 0x1d7   : > { %v756_v54 = vpop.f32.mrb[1].mxu1 }
 0x1d8   : > { %2418 = vmatmul.mubr.msk.f32.vlgmr.msra.gmra.mrb[2].mxu1 %vm610_vm1, %v686_v51  ;;  %2595 = vmatprep.mubr.msk.f32.mxu0 %vm610_vm1, %v686_v51 }
 0x1d9   : > { %2596 = vmatmul.mubr.msk.f32.vlgmr.msra.gmra.mrb[4].mxu0 %vm610_vm1, %v3802_v52  ;;  %905 = vmatprep.mubr.f32.mxu1 %v3355_v1 }
 0x1db   : > { %v825_v55 = vpop.f32.mrb[2].mxu0 }
 0x1dc   : > { %2419 = vmatmul.mubr.msk.f32.gmra.mrb[4].mxu1 %vm610_vm1, %v3802_v52  ;;  %v2586_v56 = vpop.f32.mrb[3].mxu0 }
 0x2ab   : > { %v901_v2 = vpop.f32.mrb[2].mxu1 }
 0x2ac   : > { %v987_v4 = vadd.f32 %v901_v2, %v754_v53  ;;  %v903_v6 = vpop.f32.mrb[3].mxu1  ;;  %v2597_v7 = vpop.f32.mrb[4].mxu0 }
 0x2ad   : > { %v988_v8 = vadd.f32 %v903_v6, %v756_v54  ;;  %v992_v10 = vadd.f32 %v2597_v7, %v825_v55  ;;  %v978_v14 = vpop.f32.mrb[5].mxu0 }
 0x2ae   : > { %v1009_v15 = vadd.f32 %v3819_v63, %v987_v4  ;;  %v989_v16 = vadd.f32 %v978_v14, %v825_v55  ;;  %v563_v4 = vld [vmem:[#allocation11 + $0x8] sm:$0xff] }
 0x2af   : > { %v1014_v17 = vadd.f32 %v3821_v3, %v992_v10  ;;  %v907_v18 = vpop.f32.mrb[4].mxu1  ;;  %v1010_v28 = vadd.f32 %v3823_v9, %v988_v8 }
 0x2b0   : > { %v1015_v19 = vmax.f32 %v1009_v15, 0.0  ;;  %v1011_v21 = vadd.f32 %v3821_v3, %v989_v16  ;;  %v990_v23 = vadd.f32 %v907_v18, %v754_v53  ;;  %v909_v27 = vpop.f32.mrb[5].mxu1  ;;  %v564_v15 = vld [vmem:[#allocation11 + $0x10] sm:$0xff]  ;;  %v565_v16 = vld [vmem:[#allocation11 + $0x18] sm:$0xff] }
 0x2b1   : > { %v1020_v29 = vmax.f32 %v1014_v17, 0.0  ;;  %v991_v30 = vadd.f32 %v909_v27, %v756_v54  ;;  %v1016_v37 = vmax.f32 %v1010_v28, 0.0  ;;  %v568_v27 = vld [vmem:[#allocation11 + $0x30] sm:$0xff]  ;;  %v569_v28 = vld [vmem:[#allocation11 + $0x38] sm:$0xff] }
 0x2b2   : > { %v1017_v31 = vmax.f32 %v1011_v21, 0.0  ;;  %2602 = vmatprep.mubr.f32.mxu1 %v1015_v19  ;;  %v1012_v41 = vadd.f32 %v3819_v63, %v990_v23  ;;  %v3842_v19 = vpack.c.bf16 %v565_v16, %v564_v15  ;;  %v567_v21 = vld [vmem:[#allocation11 + $0x28] sm:$0xff]  ;;  %v596_v15 = vld [vmem:[#allocation14 + $0xa0] sm:$0xff] }
 0x2b3   : > { %v1013_v32 = vadd.f32 %v3823_v9, %v991_v30  ;;  %v571_v30 = vld [vmem:[#allocation13] sm:$0xff]  ;;  %v597_v16 = vld [vmem:[#allocation14 + $0xa8] sm:$0xff] }
 0x2b4   : > { %v2759_v36 = vpack.c.bf16 %v1020_v29, %v1017_v31  ;;  %v1018_v43 = vmax.f32 %v1012_v41, 0.0  ;;  %v3852_v29 = vpack.c.bf16 %v569_v28, %v568_v27  ;;  %v572_v31 = vld [vmem:[#allocation13 + $0x8] sm:$0xff]  ;;  %v598_v27 = vld [vmem:[#allocation14 + $0xb0] sm:$0xff]  ;;  %v599_v28 = vld [vmem:[#allocation14 + $0xb8] sm:$0xff] }
 0x2b5   : > { %v1019_v39 = vmax.f32 %v1013_v32, 0.0  ;;  %v3857_v32 = vpack.c.bf16 %v572_v31, %v571_v30  ;;  %v2799_v31 = vpack.c.bf16 %v599_v28, %v598_v27 }
 0x2b7   : > { %v2755_v40 = vpack.c.bf16 %v1019_v39, %v1016_v37  ;;  %2780 = vmatprep.subr.bf16.mxu0 %v3857_v32 }
 0x2b8   : > { %2782 = vmatpush3.bf16.msra.mxu0 %v3857_v32 }
 0x2b9   : > { %2756 = vmatprep.subr.bf16.mxu1 %v2755_v40 }
 0x2ba   : > { %2758 = vmatpush3.bf16.xpose.msra.mxu1 %v2755_v40 }
 0x2bb   : > { %2760 = vmatprep.subr.bf16.mxu1 %v2759_v36 }
 0x2c1   : > { %2603 = vmatmul.mubr.f32.vlgmr.msra.gmra.mrb[6].mxu1 %v1018_v43 }
 0x2c2   : > { %2762 = vmatpush3.bf16.msra.mxu1 %v2759_v36 }
 0x394   : > { %v2604_v47 = vpop.f32.mrb[6].mxu1 }
 0x395   : > { %v1087_v48 = vpop.f32.mrb[7].mxu1  ;;  %v1100_v50 = vsel %vm1096_vm2, %v2604_v47, -inf }
 0x396   : > { %v1097_v49 = vsel %vm1096_vm2, %v1087_v48, -inf }
 0x397   : > { %1098 = vmax.xlane.f32.xlu0 %v1097_v49  ;;  %v573_v49 = vld [vmem:[#allocation13 + $0x10] sm:$0xff] }
 0x39b   : > { %1101 = vmax.xlane.f32.xlu0 %v1100_v50  ;;  %v574_v50 = vld [vmem:[#allocation13 + $0x18] sm:$0xff] }
 0x3b1   : > { %1200 = vrot.lane.b32.xlu0 %v686_v51, %s3356_s26  ;;  %v562_v51 = vld [vmem:[#allocation11] sm:$0xff] }
 0x3b2   : > { %v3838_v6 = vpack.c.bf16 %v563_v4, %v562_v51 }
 0x3b4   : > { %2764 = vmatprep.subr.bf16.mxu1 %v3838_v6 }
 0x424   : > { %v1099_v53 = vpop.xlane.xlu0 %1098 }
 0x425   : > { %v1103_v54 = vsub.f32 %v1087_v48, %v1099_v53  ;;  %v3873_v53 = vpack.c.bf16 %v574_v50, %v573_v49  ;;  %v602_v49 = vld [vmem:[#allocation14 + $0xd0] sm:$0xff]  ;;  %v603_v50 = vld [vmem:[#allocation14 + $0xd8] sm:$0xff] }
 0x427   : > { %v1105_v55 = vmul.f32 1.442695, %v1103_v54  ;;  %2784 = vmatprep.subr.bf16.mxu0 %v3873_v53  ;;  %v592_v54 = vld [vmem:[#allocation14 + $0x80] sm:$0xff] }
 0x428   : > { %v1102_v56 = vpop.xlane.xlu0 %1101  ;;  %2786 = vmatpush3.bf16.msra.mxu0 %v3873_v53 }
 0x429   : > { %3015 = vpow2.f32 %v1105_v55  ;;  %v1104_v57 = vsub.f32 %v2604_v47, %v1102_v56  ;;  %v593_v55 = vld [vmem:[#allocation14 + $0x88] sm:$0xff]  ;;  %v3880_v56 = vld [vmem:[%s4099_s1] ss:$0 sm:$0xff]  ;;  %s3997_s1 = scalar_lea.hbm %s4102_s12, %s2449_s7 }
 0x42b   : > { %v1107_v59 = vmul.f32 1.442695, %v1104_v57 }
 0x42c   : > { %v1201_v36 = vpop.permute.xlu0 %1200 }
 0x42d   : > { %3017 = vpow2.f32 %v1107_v59  ;;  %v1206_v41 = vsel %vm610_vm1, %v3755_v24, %v1201_v36  ;;  %v576_v59 = vld [vmem:[#allocation14] sm:$0xff]  ;;  %v582_v36 = vld [vmem:[#allocation14 + $0x30] sm:$0xff] }
 0x433   : > { %v3016_v60 = vpop.eup %3015 }
 0x434   : > { %v1109_v61 = vsel %vm1096_vm2, %v3016_v60, 0.0 }
 0x435   : > { %1110 = vadd.xlane.f32.xlu1 %v1109_v61 }
 0x437   : > { %v3018_v62 = vpop.eup %3017 }
 0x438   : > { %v1112_v2 = vsel %vm1096_vm2, %v3018_v62, 0.0 }
 0x439   : > { %1113 = vadd.xlane.f32.xlu1 %v1112_v2  ;;  %v595_v2 = vld [vmem:[#allocation14 + $0x98] sm:$0xff] }
 0x44a   : > { %1202 = vrot.lane.b32.xlu1 %v3802_v52, %s3356_s26  ;;  %v566_v52 = vld [vmem:[#allocation11 + $0x20] sm:$0xff] }
 0x44b   : > { %v3847_v23 = vpack.c.bf16 %v567_v21, %v566_v52  ;;  %v580_v52 = vld [vmem:[#allocation14 + $0x20] sm:$0xff]  ;;  %v581_v21 = vld [vmem:[#allocation14 + $0x28] sm:$0xff] }
 0x44c   : > { %v2797_v30 = vpack.c.bf16 %v581_v21, %v580_v52 }
 0x4c2   : > { %v1111_v7 = vpop.xlane.xlu1 %1110 }
 0x4c3   : > { %3019 = vrcp.f32 %v1111_v7 }
 0x4c6   : > { %v1114_v8 = vpop.xlane.xlu1 %1113 }
 0x4c7   : > { %3021 = vrcp.f32 %v1114_v8 }
 0x4ca   : > { %v1203_v37 = vpop.permute.xlu1 %1202 }
 0x4cb   : > { %v1207_v43 = vsel %vm610_vm1, %v3755_v24, %v1203_v37  ;;  %v583_v37 = vld [vmem:[#allocation14 + $0x38] sm:$0xff] }
 0x4cd   : > { %v3020_v10 = vpop.eup %3019 }
 0x4ce   : > { %v1117_v14 = vmul.f32 %v3020_v10, %v3016_v60  ;;  %v577_v60 = vld [vmem:[#allocation14 + $0x8] sm:$0xff]  ;;  %v578_v10 = vld [vmem:[#allocation14 + $0x10] sm:$0xff] }
 0x4cf   : > { %v2789_v4 = vpack.c.bf16 %v577_v60, %v576_v59  ;;  %v605_v59 = vld [vmem:[#allocation14 + $0xe8] sm:$0xff] }
 0x4d0   : > { %2609 = vmatprep.mubr.msk.f32.mxu1 %vm1096_vm2, %v1117_v14  ;;  %v579_v14 = vld [vmem:[#allocation14 + $0x18] sm:$0xff] }
 0x4d1   : > { %v3022_v17 = vpop.eup %3021 }
 0x4d2   : > { %v1118_v18 = vmul.f32 %v3022_v17, %v3018_v62  ;;  %v594_v62 = vld [vmem:[#allocation14 + $0x90] sm:$0xff]  ;;  %v2793_v17 = vpack.c.bf16 %v579_v14, %v578_v10  ;;  %v591_v10 = vld [vmem:[#allocation14 + $0x78] sm:$0xff] }
 0x4d3   : > { %v2791_v8 = vpack.c.bf16 %v595_v2, %v594_v62  ;;  %v589_v62 = vld [vmem:[#allocation14 + $0x68] sm:$0xff] }
 0x4d4   : > { %2610 = vmatmul.mubr.msk.f32.vlgmr.msra.gmra.mrb[8].mxu1 %vm1096_vm2, %v1118_v18  ;;  %v2795_v18 = vpack.c.bf16 %v597_v16, %v596_v15  ;;  %v3357_v15 = vmov 1966171168  }
 0x4d5   : > { %2766 = vmatpush3.bf16.msra.mxu1 %v3838_v6  ;;  %v1390_v16 = vunpack.c.l.s4 %v3357_v15 }
 0x4d6   : > { %2768 = vmatprep.subr.bf16.mxu1 %v3842_v19 }
 0x4d9   : > { %2770 = vmatpush3.bf16.msra.mxu1 %v3842_v19 }
 0x4da   : > { %2772 = vmatprep.subr.bf16.mxu1 %v3847_v23 }
 0x4dd   : > { %2774 = vmatpush3.bf16.msra.mxu1 %v3847_v23 }
 0x4de   : > { %2776 = vmatprep.subr.bf16.mxu1 %v3852_v29 }
 0x4e1   : > { %2778 = vmatpush3.bf16.msra.mxu1 %v3852_v29 }
 0x4e2   : > { %2819 = vmatprep.subr.bf16.mxu1 %v3353_v0 }
 0x5a7   : > { %v2611_v39 = vpop.f32.mrb[8].mxu1 }
 0x5a8   : > { %v1191_v40 = vpop.f32.mrb[9].mxu1  ;;  %v1209_v48 = vadd.f32 %v2611_v39, %v1207_v43  ;;  %v600_v39 = vld [vmem:[#allocation14 + $0xc0] sm:$0xff] }
 0x5a9   : > { %v1208_v47 = vadd.f32 %v1206_v41, %v1191_v40  ;;  %v601_v40 = vld [vmem:[#allocation14 + $0xc8] sm:$0xff]  ;;  %v2801_v41 = vpack.c.bf16 %v583_v37, %v582_v36 }
 0x5aa   : > { %v2803_v43 = vpack.c.bf16 %v601_v40, %v600_v39 }
 0x5ab   : > { %2628 = vmatprep.mubr.msk.f32.mxu1 %vm1216_vm3, %v1208_v47  ;;  %v584_v47 = vld [vmem:[#allocation14 + $0x40] sm:$0xff] }
 0x5ac   : > { %2629 = vmatmul.mubr.msk.f32.vlgmr.msra.gmra.mrb[10].mxu1 %vm1216_vm3, %v1209_v48  ;;  %v585_v48 = vld [vmem:[#allocation14 + $0x48] sm:$0xff] }
 0x5ad   : > { %2821 = vmatpush3.bf16.msra.mxu1 %v3737_v5  ;;  %2650 = vmatprep.mubr.msk.f32.mxu1 %vm3354_vm0, %v3355_v1  ;;  %v2787_v5 = vpack.c.bf16 %v593_v55, %v592_v54  ;;  %v2805_v54 = vpack.c.bf16 %v585_v48, %v584_v47  ;;  %v2807_v55 = vpack.c.bf16 %v603_v50, %v602_v49 }
 0x5ae   : > { %2822 = vmatprep.subr.bf16.mxu1 %v3353_v0 }
 0x5af   : > { %2788 = vmatprep.subr.bf16.mxu0 %v2787_v5  ;;  %v586_v5 = vld [vmem:[#allocation14 + $0x50] sm:$0xff] }
 0x5b1   : > { %2824 = vmatpush3.bf16.msra.mxu1 %v3740_v11 }
 0x5b2   : > { %2826 = vmatprep.subr.bf16.mxu1 %v3742_v12 }
 0x67f   : > { %v2630_v11 = vpop.f32.mrb[10].mxu1 }
 0x680   : > { %v1295_v12 = vadd.f32 %v2630_v11, %v3880_v56  ;;  %v1289_v57 = vpop.f32.mrb[11].mxu1  ;;  %v587_v11 = vld [vmem:[#allocation14 + $0x58] sm:$0xff] }
 0x681   : > { %v1290_v61 = vadd.f32 %v3880_v56, %v1289_v57  ;;  %v604_v57 = vld [vmem:[#allocation14 + $0xe0] sm:$0xff] }
 0x682   : > { %v1299_v7 = vmax.f32 %v1295_v12, 0.0  ;;  %v2809_v12 = vpack.c.bf16 %v587_v11, %v586_v5  ;;  %v2811_v60 = vpack.c.bf16 %v605_v59, %v604_v57 }
 0x683   : > { %v1298_v51 = vmax.f32 %v1290_v61, 0.0  ;;  %v588_v61 = vld [vmem:[#allocation14 + $0x60] sm:$0xff] }
 0x684   : > { %v2813_v2 = vpack.c.bf16 %v589_v62, %v588_v61 }
 0x685   : > { %2639 = vmatprep.mubr.msk.f32.mxu0 %vm610_vm1, %v1298_v51  ;;  %v606_v51 = vld [vmem:[#allocation14 + $0xf0] sm:$0xff] }
 0x686   : > { %2640 = vmatmul.mubr.msk.f32.vlgmr.msra.gmra.mrb[6].mxu0 %vm610_vm1, %v1299_v7 }
 0x687   : > { %2790 = vmatpush3.bf16.msra.mxu0 %v2789_v4  ;;  %v607_v4 = vld [vmem:[#allocation14 + $0xf8] sm:$0xff] }
 0x688   : > { %2792 = vmatprep.subr.bf16.mxu0 %v2791_v8  ;;  %v2815_v7 = vpack.c.bf16 %v607_v4, %v606_v51  ;;  %v590_v8 = vld [vmem:[#allocation14 + $0x70] sm:$0xff] }
 0x689   : > { %v2817_v14 = vpack.c.bf16 %v591_v10, %v590_v8 }
 0x68b   : > { %2794 = vmatpush3.bf16.msra.mxu0 %v2793_v17  ;;  %v1391_v17 = vunpack.c.0.s8 %v1390_v16 }
 0x68c   : > { %2796 = vmatprep.subr.bf16.mxu0 %v2795_v18  ;;  %v3890_v18 = vld [vmem:[%s4100_s16] ss:$0 sm:$0xff]  ;;  %s3261_s16 = sshll.u32 %s3358_s29, 4  ;;  %s3262_s16 = int_to_ptr.vmem [resolvable:$false] %s3261_s16 }
 0x68d   : > { %v1394_v27 = vsub.s32 %v1391_v17, %v3811_v58  ;;  %s3263_s9 = scalar_lea.vmem %s3262_s16, 512  ;;  %p3264_p13 = scmp.lt.s32.totalorder %s3999_s15, %s3262_s16 }
 0x68e   : > { %p3265_p3 = scmp.lt.s32.totalorder %s3263_s9, %s3257_s19 }
 0x68f   : > { %2798 = vmatpush3.bf16.msra.mxu0 %v2797_v30 }
 0x690   : > { %2800 = vmatprep.subr.bf16.mxu0 %v2799_v31  ;;  %p3266_p6 = por %p3265_p3, %p3264_p13 }
 0x692   : > { %p3267_p9 = pnand %p3266_p6, %p3260_p12 }
 0x693   : > { %2802 = vmatpush3.bf16.msra.mxu0 %v2801_v41 }
 0x694   : > { %2804 = vmatprep.subr.bf16.mxu0 %v2803_v43  ;;  %v2430_v43 = vld [vmem:[%s4101_s2] ss:$0 sm:$0xff] }
 0x697   : > { %2806 = vmatpush3.bf16.msra.mxu0 %v2805_v54 }
 0x698   : > { %2808 = vmatprep.subr.bf16.mxu0 %v2807_v55 }
 0x69b   : > { %2810 = vmatpush3.bf16.msra.mxu0 %v2809_v12 }
 0x69c   : > { %2812 = vmatprep.subr.bf16.mxu0 %v2811_v60 }
 0x69f   : > { %2814 = vmatpush3.bf16.msra.mxu0 %v2813_v2 }
 0x6a0   : > { %2816 = vmatprep.subr.bf16.mxu0 %v2815_v7 }
 0x6a3   : > { %2818 = vmatpush3.bf16.msra.mxu0 %v2817_v14 }
 0x6a4   : > { %2848 = vmatprep.subr.bf16.mxu0 %v3775_v35 }
 0x759   : > { %v2641_v52 = vpop.f32.mrb[6].mxu0 }
 0x75a   : > { %v3893_v21 = vadd.f32 %v2641_v52, %v3890_v18  ;;  %v1378_v28 = vpop.f32.mrb[7].mxu0 }
 0x75b   : > { %v3897_v30 = vadd.f32 %v3890_v18, %v1378_v28 }
 0x75c   : > { %v1388_v31 = vmax.f32 %v3893_v21, 0.0 }
 0x75d   : > { %v1387_v36 = vmax.f32 %v3897_v30, 0.0 }
 0x75e   : > { %v1402_v37 = vrot.slane %v1388_v31, %v1394_v27 }
 0x75f   : > { %v1395_v39 = vrot.slane %v1387_v36, %v1394_v27 }
 0x761   : > { %v1411_v40 = vcombine.low %v1395_v39, %v1402_v37  ;;  %v1412_v41 = vcombine.high %v1395_v39, %v1402_v37 }
 0x763   : > { %1479 = vmatprep.mubr.f32.mxu0 %v1412_v41 }
 0x764   : > { %1480 = vmatmul.mubr.f32.vlgmr.msra.gmra.mrb[8].mxu0 %v1411_v40 }
 0x765   : > { %2850 = vmatpush3.bf16.msra.mxu0 %v3775_v35 }
 0x766   : > { %2852 = vmatprep.subr.bf16.mxu0 %v3791_v44 }
 0x769   : > { %2854 = vmatpush3.bf16.msra.mxu0 %v3791_v44 }
 0x837   : > { %v2522_v58 = vpop.f32.mrb[8].mxu0 }
 0x838   : > { %v2523_v47 = vpop.f32.mrb[9].mxu0 }
 0x839   : > { %v2524_v48 = vadd.f32 %v2523_v47, %v2522_v58 }
 0x83b   : > { %v1482_v49 = vadd.f32 %v2524_v48, %v2430_v43 }
 0x83d   : > { %v1485_v50 = vmax.f32 %v1482_v49, 0.0 }
 0x83f   : > { %v3912_v54 = vsub.f32 %v3755_v24, %v1485_v50 }
 0x841   : > { %2651 = vmatmul.mubr.msk.f32.vlgmr.msra.gmra.mrb[12].mxu1 %vm610_vm1, %v3912_v54 }
 0x842   : > { %2828 = vmatpush1.bf16.msra.mxu1 %v3744_v13  ;;  %1628 = vmatprep.mubr.f32.mxu1 %v3355_v1 }
 0x843   : > { %2830 = vmatprep.subr.bf16.mxu1 %v3748_v20 }
 0x846   : > { %2832 = vmatpush1.bf16.msra.mxu1 %v3751_v22 }
 0x847   : > { %2833 = vmatprep.subr.bf16.mxu1 %v3353_v0 }
 0x849   : > { %2432 = vmatmul.mubr.msk.f32.vlgmr.msra.gmra.mrb[14].mxu1 %vm610_vm1, %v3912_v54 }
 0x84a   : > { %2835 = vmatpush3.bf16.msra.mxu1 %v3757_v25  ;;  %2661 = vmatprep.mubr.msk.f32.mxu1 %vm3354_vm0, %v3355_v1 }
 0x84b   : > { %2836 = vmatprep.subr.bf16.mxu1 %v3353_v0 }
 0x84e   : > { %2838 = vmatpush3.bf16.msra.mxu1 %v3769_v34 }
 0x84f   : > { %2840 = vmatprep.subr.bf16.mxu1 %v3760_v26 }
 0x851   : > { %2662 = vmatmul.mubr.msk.f32.vlgmr.msra.gmra.mrb[16].mxu1 %vm610_vm1, %v3912_v54 }
 0x852   : > { %2842 = vmatpush1.bf16.msra.mxu1 %v3766_v33  ;;  %1775 = vmatprep.mubr.f32.mxu1 %v3355_v1 }
 0x853   : > { %2844 = vmatprep.subr.bf16.mxu1 %v3786_v38 }
 0x856   : > { %2846 = vmatpush1.bf16.msra.mxu1 %v3788_v42 }
 0x914   : > { %v1556_v13 = vpop.f32.mrb[12].mxu1 }
 0x915   : > { %v1560_v20 = vadd.f32 %v1556_v13, %v3796_v45  ;;  %v1561_v0 = vadd.f32 %v1556_v13, %v3798_v46  ;;  %v2652_v22 = vpop.f32.mrb[13].mxu1 }
 0x917   : > { %v3937_v24 = vmax.f32 %v1560_v20, 0.0  ;;  %v3939_v25 = vmax.f32 %v1561_v0, 0.0 }
 0x919   : > { %2434 = vmatmul.mubr.msk.f32.vlgmr.msra.gmra.mrb[18].mxu1 %vm610_vm1, %v3937_v24  ;;  %2672 = vmatprep.mubr.msk.f32.mxu0 %vm610_vm1, %v3937_v24 }
 0x91a   : > { %2673 = vmatmul.mubr.msk.f32.vlgmr.msra.gmra.mrb[10].mxu0 %vm610_vm1, %v3939_v25  ;;  %1781 = vmatprep.mubr.f32.mxu1 %v3355_v1 }
 0x91c   : > { %v1630_v26 = vpop.f32.mrb[14].mxu1 }
 0x91d   : > { %v1632_v33 = vpop.f32.mrb[15].mxu1  ;;  %2435 = vmatmul.mubr.msk.f32.gmra.mrb[20].mxu1 %vm610_vm1, %v3939_v25 }
 0x924   : > { %v1701_v34 = vpop.f32.mrb[16].mxu1 }
 0x925   : > { %v2663_v35 = vpop.f32.mrb[17].mxu1 }
 0x9ec   : > { %v1777_v38 = vpop.f32.mrb[18].mxu1 }
 0x9ed   : > { %v1863_v42 = vadd.f32 %v1777_v38, %v1630_v26  ;;  %v1779_v44 = vpop.f32.mrb[19].mxu1  ;;  %v2674_v45 = vpop.f32.mrb[10].mxu0 }
 0x9ee   : > { %v1864_v46 = vadd.f32 %v1779_v44, %v1632_v33  ;;  %v1868_v55 = vadd.f32 %v2674_v45, %v1701_v34  ;;  %v1854_v5 = vpop.f32.mrb[11].mxu0 }
 0x9ef   : > { %v1869_v11 = vadd.f32 %v1863_v42, %v3819_v63  ;;  %v1865_v12 = vadd.f32 %v1854_v5, %v1701_v34 }
 0x9f0   : > { %v1874_v57 = vadd.f32 %v1868_v55, %v3821_v3  ;;  %v1783_v1 = vpop.f32.mrb[20].mxu1  ;;  %v1870_v2 = vadd.f32 %v1864_v46, %v3823_v9 }
 0x9f1   : > { %v1875_v59 = vmax.f32 %v1869_v11, 0.0  ;;  %v1871_v60 = vadd.f32 %v1865_v12, %v3821_v3  ;;  %v1866_v61 = vadd.f32 %v1783_v1, %v1630_v26  ;;  %v1785_v62 = vpop.f32.mrb[21].mxu1 }
 0x9f2   : > { %v1880_v51 = vmax.f32 %v1874_v57, 0.0  ;;  %v1867_v4 = vadd.f32 %v1785_v62, %v1632_v33  ;;  %v1876_v14 = vmax.f32 %v1870_v2, 0.0 }
 0x9f3   : > { %v1877_v7 = vmax.f32 %v1871_v60, 0.0  ;;  %2679 = vmatprep.mubr.f32.mxu1 %v1875_v59  ;;  %v1872_v3 = vadd.f32 %v1866_v61, %v3819_v63 }
 0x9f4   : > { %v1873_v8 = vadd.f32 %v1867_v4, %v3823_v9 }
 0x9f5   : > { %v2859_v10 = vpack.c.bf16 %v1880_v51, %v1877_v7  ;;  %v1878_v17 = vmax.f32 %v1872_v3, 0.0 }
 0x9f6   : > { %v1879_v15 = vmax.f32 %v1873_v8, 0.0 }
 0x9f7   : > { %2860 = vmatprep.subr.bf16.mxu0 %v2859_v10 }
 0x9f8   : > { %2862 = vmatpush3.bf16.msra.mxu0 %v2859_v10  ;;  %v2855_v16 = vpack.c.bf16 %v1879_v15, %v1876_v14 }
 0x9f9   : > { %2864 = vmatprep.subr.bf16.mxu0 %v3838_v6 }
 0x9fa   : > { %2856 = vmatprep.subr.bf16.mxu1 %v2855_v16 }
 0x9fb   : > { %2858 = vmatpush3.bf16.xpose.msra.mxu1 %v2855_v16 }
 0x9fc   : > { %2880 = vmatprep.subr.bf16.mxu1 %v3857_v32 }
 0xa02   : > { %2680 = vmatmul.mubr.f32.vlgmr.msra.gmra.mrb[22].mxu1 %v1878_v17 }
 0xa03   : > { %2882 = vmatpush3.bf16.msra.mxu1 %v3857_v32 }
 0xa04   : > { %2884 = vmatprep.subr.bf16.mxu1 %v3873_v53 }
 0xa07   : > { %2886 = vmatpush3.bf16.msra.mxu1 %v3873_v53 }
 0xad5   : > { %v2681_v9 = vpop.f32.mrb[22].mxu1 }
 0xad6   : > { %v1947_v52 = vpop.f32.mrb[23].mxu1  ;;  %v1959_v27 = vsel %vm1096_vm2, %v2681_v9, -inf }
 0xad7   : > { %1960 = vmax.xlane.f32.xlu0 %v1959_v27  ;;  %v1956_v28 = vsel %vm1096_vm2, %v1947_v52, -inf }
 0xad8   : > { %1957 = vmax.xlane.f32.xlu1 %v1956_v28 }
 0xb64   : > { %v1961_v37 = vpop.xlane.xlu0 %1960 }
 0xb65   : > { %v1963_v63 = vsub.f32 %v2681_v9, %v1961_v37  ;;  %v1958_v39 = vpop.xlane.xlu1 %1957 }
 0xb66   : > { %v1962_v40 = vsub.f32 %v1947_v52, %v1958_v39 }
 0xb67   : > { %v1966_v41 = vmul.f32 1.442695, %v1963_v63 }
 0xb68   : > { %v1964_v58 = vmul.f32 1.442695, %v1962_v40 }
 0xb69   : > { %3023 = vpow2.f32 %v1966_v41 }
 0xb6a   : > { %3025 = vpow2.f32 %v1964_v58 }
 0xb73   : > { %v3024_v32 = vpop.eup %3023 }
 0xb74   : > { %v3026_v43 = vpop.eup %3025  ;;  %v1971_v53 = vsel %vm1096_vm2, %v3024_v32, 0.0 }
 0xb75   : > { %1972 = vadd.xlane.f32.xlu1 %v1971_v53  ;;  %v1968_v47 = vsel %vm1096_vm2, %v3026_v43, 0.0 }
 0xb76   : > { %1969 = vadd.xlane.f32.xlu0 %v1968_v47 }
 0xb86   : > { %2061 = vrot.lane.b32.xlu1 %v3939_v25, %s3356_s26 }
 0xb8c   : > { %2059 = vrot.lane.b32.xlu0 %v3937_v24, %s3356_s26 }
 0xc02   : > { %v1973_v48 = vpop.xlane.xlu1 %1972 }
 0xc03   : > { %3027 = vrcp.f32 %v1973_v48  ;;  %v1970_v49 = vpop.xlane.xlu0 %1969 }
 0xc04   : > { %3029 = vrcp.f32 %v1970_v49 }
 0xc06   : > { %v2062_v24 = vpop.permute.xlu1 %2061 }
 0xc07   : > { %v2060_v22 = vpop.permute.xlu0 %2059  ;;  %v2066_v33 = vsel %vm610_vm1, %v3912_v54, %v2062_v24 }
 0xc0d   : > { %v3028_v50 = vpop.eup %3027 }
 0xc0e   : > { %v3030_v13 = vpop.eup %3029  ;;  %v1977_v0 = vmul.f32 %v3028_v50, %v3024_v32 }
 0xc0f   : > { %v1976_v20 = vmul.f32 %v3030_v13, %v3026_v43 }
 0xc11   : > { %2686 = vmatprep.mubr.msk.f32.mxu0 %vm1096_vm2, %v1976_v20 }
 0xc12   : > { %2687 = vmatmul.mubr.msk.f32.vlgmr.msra.gmra.mrb[12].mxu0 %vm1096_vm2, %v1977_v0 }
 0xc13   : > { %2866 = vmatpush3.bf16.msra.mxu0 %v3838_v6  ;;  %v2065_v6 = vsel %vm610_vm1, %v3912_v54, %v2060_v22 }
 0xc14   : > { %2868 = vmatprep.subr.bf16.mxu0 %v3842_v19 }
 0xc17   : > { %2870 = vmatpush3.bf16.msra.mxu0 %v3842_v19 }
 0xc18   : > { %2872 = vmatprep.subr.bf16.mxu0 %v3847_v23 }
 0xc1b   : > { %2874 = vmatpush3.bf16.msra.mxu0 %v3847_v23 }
 0xc1c   : > { %2876 = vmatprep.subr.bf16.mxu0 %v3852_v29 }
 0xc1f   : > { %2878 = vmatpush3.bf16.msra.mxu0 %v3852_v29 }
 0xce5   : > { %v2688_v25 = vpop.f32.mrb[12].mxu0 }
 0xce6   : > { %v2050_v26 = vpop.f32.mrb[13].mxu0  ;;  %v2068_v34 = vadd.f32 %v2688_v25, %v2066_v33 }
 0xce7   : > { %v2067_v19 = vadd.f32 %v2065_v6, %v2050_v26 }
 0xce9   : > { %2705 = vmatprep.mubr.msk.f32.mxu0 %vm1216_vm3, %v2067_v19 }
 0xcea   : > { %2706 = vmatmul.mubr.msk.f32.vlgmr.msra.gmra.mrb[14].mxu0 %vm1216_vm3, %v2068_v34 }
 0xdbd   : > { %v2707_v23 = vpop.f32.mrb[14].mxu0 }
 0xdbe   : > { %v2147_v29 = vadd.f32 %v2707_v23, %v3880_v56  ;;  %v2141_v35 = vpop.f32.mrb[15].mxu0 }
 0xdbf   : > { %v2142_v38 = vadd.f32 %v3880_v56, %v2141_v35 }
 0xdc0   : > { %v2151_v44 = vmax.f32 %v2147_v29, 0.0 }
 0xdc1   : > { %v2150_v42 = vmax.f32 %v2142_v38, 0.0 }
 0xdc3   : > { %2716 = vmatprep.mubr.msk.f32.mxu1 %vm610_vm1, %v2150_v42 }
 0xdc4   : > { %2717 = vmatmul.mubr.msk.f32.vlgmr.msra.gmra.mrb[24].mxu1 %vm610_vm1, %v2151_v44 }
 0xe97   : > { %v2718_v54 = vpop.f32.mrb[24].mxu1 }
 0xe98   : > { %v2230_v45 = vadd.f32 %v2718_v54, %v3890_v18  ;;  %v2224_v46 = vpop.f32.mrb[25].mxu1 }
 0xe99   : > { %v2225_v55 = vadd.f32 %v3890_v18, %v2224_v46 }
 0xe9a   : > { %v2234_v5 = vmax.f32 %v2230_v45, 0.0 }
 0xe9b   : > { %v2233_v56 = vmax.f32 %v2225_v55, 0.0 }
 0xe9c   : > { %v2236_v11 = vadd.f32 %v2234_v5, %v1388_v31 }
 0xe9d   : > { %v2235_v18 = vadd.f32 %v2233_v56, %v1387_v36 }
 0xe9e   : > { %2238 = vst.msk [vmem:[%s530_s28 + $0x8] sm:$0xff] %vm610_vm1, %v2236_v11 }
 0xe9f   : > { %2237 = vst.msk [vmem:[%s530_s28] sm:$0xff] %vm610_vm1, %v2235_v18 }
 0xea0   : > { %3270 = shalt.err (!%p3267_p9)
}
 0xea1   : > { %s3271_s14 = scalar_lea.hbm %s3997_s1, 256  ;;  %s3275_s7 = scalar_lea.hbm %s4102_s12, 512 }
 0xea2   : > { %p3272_p4 = scmp.ne.s32.totalorder %s3997_s1, %s3271_s14  ;;  %p3276_p5 = scmp.lt.u32.totalorder %s3997_s1, %s4102_s12 }
 0xea3   : > { %p3277_p2 = scmp.lt.u32.totalorder %s3275_s7, %s3271_s14  ;;  %p3279_p10 = scmp.lt.u32.totalorder %s3271_s14, %s3997_s1 }
 0xea4   : > { %p3273_p8 = pnand %p3272_p4, %p4103_p1 }
 0xea5   : > { %p3278_p7 = por %p3277_p2, %p3276_p5 }
 0xea6   : > { %p3274_p0 = pneg %p3273_p8 }
 0xea7   : > { %p3280_p11 = por %p3279_p10, %p3278_p7 }
 0xea9   : > { %p3281_p12 = pnand %p3280_p11, %p3274_p0 }
 0xeab   : > { %3284 = shalt.err (!%p3281_p12)
}
 0xeac   : > { %s3359_s17 = smov 128   ;;  %s3360_s19 = smov 8  }
 0xead   : > { %2917 = dma.vmem_to_hbm [thread:$0]  (%p4103_p1), %s3999_s15, 256, %s3997_s1, %s2240_s27, %s3359_s17, %s3359_s17, %s3360_s19  }
 0xeae PF: > { %s2268_s29 = sand.u32 1, %s3327_s21   ;;  %p4104_p13 = scmp.ne.s32.totalorder %s4088_s18, 0 }
 0xeaf   : > { %p4105_p3 = scmp.ge.s32.totalorder %s3339_s24, 2  ;;  %s2269_s16 = scalar_lea.sflag [#allocation4], %s2268_s29 }
 0xeb1   : > { %p2946_p6 = pnand %p4105_p3, %p4104_p13 }
 0xeb3   : > { %3322 = dma.done.wait (!%p2946_p6), %s2269_s16, 256  }
 0xeb4   : > { %3324 = vsyncadd (!%p2946_p6), %s2269_s16, 4294967040  ;;  %p29_p9 = scmp.ge.s32.totalorder %s3637_s25, 4   ;;  %s4106_s21 = smov %s3331_s22 }
 0xeb5   : > { %s4107_s22 = smov %s3335_s23  ;;  %s4108_s23 = smov %s3649_s20 }
 0xeb6   : > { %s4109_s24 = smov %s3637_s25  ;;  %31 = sbr.rel (!%p29_p9) target bundleno = 16 (0x10), region = 141 }
 0xebd   :  { %2274 = vsyncpa [#allocation3], 1 }
 0xebe   :  { %2276 = vsyncpa [#allocation3 + $0x1], 1 }
 0xebf   :  { %2277 = vsyncpa [#allocation6], 1 }
 0xec0   :  { %2278 = vsyncpa [#allocation9], 1 }
 0xec1   :  { %2279 = vsyncpa [#allocation12], 1 }
 0xec2   :  { %2280 = vsyncpa [#allocation15], 1 }
 0xec3   :  { %2281 = vsyncpa [#allocation4], 1 }
 0xec4   :  { %2283 = vsyncpa [#allocation4 + $0x1], 1 }

</bundles_post_ra>
